<compile_context>
chip_gen: v7x
topology: tpu7x:2x2x1
jax: 0.10.0
libtpu: 0.0.40
codegen_flags: <defaults>
</compile_context>

<pallas_src>
import functools
import math

import jax
import jax.numpy as jnp
from jax.experimental import pallas as pl
from jax.experimental.pallas import tpu as pltpu


# ----------------------------- config (synthetic BERT) -----------------------------
class Config:
    vocab_size = 100
    type_vocab_size = 2
    max_position = 32
    hidden = 32              # bert hidden size
    num_heads = 2
    num_layers = 2
    intermediate = 64
    bert_cls_emb_dim = 32    # == hidden (pooler output feeds the classifier head)
    num_answer_class = 4
    batch = 2
    seq = 8
    ln_eps = 1e-12


cfg = Config()


# ----------------------------- small math helpers -----------------------------
def _layernorm(x, g, b, eps):
    mu = jnp.mean(x, axis=-1, keepdims=True)
    xc = x - mu
    var = jnp.mean(xc * xc, axis=-1, keepdims=True)
    return xc * jax.lax.rsqrt(var + eps) * g + b


def _gelu_tanh(x):
    # TODO(synk): tanh-approx GELU; PyTorch default nn.GELU is exact erf (~1e-3 diff).
    c = jnp.float32(0.7978845608028654)  # sqrt(2/pi)
    return 0.5 * x * (1.0 + jnp.tanh(c * (x + 0.044715 * x * x * x)))


# ----------------------------- fused kernel -----------------------------
def _fused_text_kernel(
        emb_ref, bias_ref, eg_ref, ebeta_ref,
        wqkv_ref, bqkv_ref, wo_ref, bo_ref, g1_ref, beta1_ref,
        w1_ref, b1_ref, w2_ref, b2_ref, g2_ref, beta2_ref,
        pw_ref, pb_ref, cw_ref, cb_ref,
        out_ref,
        x_vmem,
        *, batch_tile, seq, num_heads, head_dim, eps):
    layer = pl.program_id(1)
    hidden = num_heads * head_dim
    bf16 = jnp.bfloat16

    # First layer step for this batch tile: embedding LayerNorm (f32).
    @pl.when(layer == 0)
    def _():
        x_vmem[...] = _layernorm(emb_ref[...], eg_ref[...], ebeta_ref[...], eps)

    x = x_vmem[...]                                   # [TB*S, H] f32, VMEM-resident

    # ---- fused QKV projection: one [TB*S, H] x [H, 3H] bf16 MXU matmul ----
    # (1/sqrt(head_dim) is pre-folded into the Q columns of wqkv/bqkv at prep time.)
    qkv = jnp.dot(x.astype(bf16), wqkv_ref[0],
                  preferred_element_type=jnp.float32) + bqkv_ref[0]   # [TB*S, 3H] f32
    wo = wo_ref[0]                                    # [H, H] bf16

    # ---- multi-head attention: loop over batch rows (mask differs per row) and
    # heads; head-concat is folded into the output projection. ----
    attn_rows = []
    for b in range(batch_tile):
        qkv_b = qkv[b * seq:(b + 1) * seq, :]         # [S, 3H]
        bias_b = bias_ref[b]                          # [1, S] additive key mask
        acc = jnp.zeros((seq, hidden), jnp.float32)
        for h in range(num_heads):
            lo = h * head_dim
            qh = qkv_b[:, lo:lo + head_dim].astype(bf16)
            kh = qkv_b[:, hidden + lo:hidden + lo + head_dim].astype(bf16)
            vh = qkv_b[:, 2 * hidden + lo:2 * hidden + lo + head_dim].astype(bf16)
            # q @ k^T without an explicit transpose: contract the head dim of both.
            s = jax.lax.dot_general(qh, kh, (((1,), (1,)), ((), ())),
                                    preferred_element_type=jnp.float32) + bias_b
            s = s - jnp.max(s, axis=-1, keepdims=True)
            p = jnp.exp(s)
            p = p * pl.reciprocal(jnp.sum(p, axis=-1, keepdims=True), approx=True)
            ctx = jnp.dot(p.astype(bf16), vh, preferred_element_type=jnp.float32)
            acc = acc + jnp.dot(ctx.astype(bf16), wo[lo:lo + head_dim, :],
                                preferred_element_type=jnp.float32)
        attn_rows.append(acc)
    attn = jnp.concatenate(attn_rows, axis=0) + bo_ref[0]            # [TB*S, H]

    # ---- residual + LN1 ----
    x = _layernorm(attn + x, g1_ref[0], beta1_ref[0], eps)

    # ---- FFN (GELU) + residual + LN2, bf16 operands / f32 accumulation ----
    h1 = _gelu_tanh(jnp.dot(x.astype(bf16), w1_ref[0],
                            preferred_element_type=jnp.float32) + b1_ref[0])
    h2 = jnp.dot(h1.astype(bf16), w2_ref[0],
                 preferred_element_type=jnp.float32) + b2_ref[0]
    x = _layernorm(h2 + x, g2_ref[0], beta2_ref[0], eps)
    x_vmem[...] = x

    # Last layer step: pooler (tanh dense) + classifier on the CLS rows only.
    @pl.when(layer == pl.num_programs(1) - 1)
    def _():
        cls = jnp.concatenate([x[b * seq:b * seq + 1, :] for b in range(batch_tile)],
                              axis=0)                                 # [TB, H]
        pooled = jnp.tanh(jnp.dot(cls.astype(bf16), pw_ref[...],
                                  preferred_element_type=jnp.float32) + pb_ref[...])
        logits = jnp.dot(pooled.astype(bf16), cw_ref[...],
                         preferred_element_type=jnp.float32) + cb_ref[...]
        out_ref[0] = logits.astype(out_ref.dtype)                     # [TB, C]


def fused_text_model(kparams, emb, mask_bias, *, batch_tile=None):
    B, S, H = emb.shape
    L = cfg.num_layers
    I = cfg.intermediate
    C = cfg.num_answer_class
    nh = cfg.num_heads
    hd = H // nh
    TB = B if batch_tile is None else batch_tile
    assert B % TB == 0, "batch must be divisible by the batch tile"

    kernel = functools.partial(_fused_text_kernel, batch_tile=TB, seq=S,
                               num_heads=nh, head_dim=hd, eps=cfg.ln_eps)

    def layer_spec(shape):     # per-layer stacked weight, walked by the layer axis
        return pl.BlockSpec((1,) + shape, lambda bt, l: (l, 0, 0))

    def const_spec(shape):     # shared weight, same block every step (no re-DMA)
        return pl.BlockSpec(shape, lambda bt, l: (0, 0))

    out = pl.pallas_call(
        kernel,
        grid=(B // TB, L),
        in_specs=[
            pl.BlockSpec((TB * S, H), lambda bt, l: (bt, 0)),    # embeddings (flat)
            pl.BlockSpec((TB, 1, S), lambda bt, l: (bt, 0, 0)),  # attn mask bias
            const_spec((1, H)),                                  # emb_ln_g
            const_spec((1, H)),                                  # emb_ln_b
            layer_spec((H, 3 * H)),                              # wqkv (fused, bf16)
            layer_spec((1, 3 * H)),                              # bqkv
            layer_spec((H, H)),                                  # wo (bf16)
            layer_spec((1, H)),                                  # bo
            layer_spec((1, H)),                                  # ln1_g
            layer_spec((1, H)),                                  # ln1_b
            layer_spec((H, I)),                                  # w1 (bf16)
            layer_spec((1, I)),                                  # b1
            layer_spec((I, H)),                                  # w2 (bf16)
            layer_spec((1, H)),                                  # b2
            layer_spec((1, H)),                                  # ln2_g
            layer_spec((1, H)),                                  # ln2_b
            const_spec((H, H)),                                  # pool_w (bf16)
            const_spec((1, H)),                                  # pool_b
            const_spec((H, C)),                                  # cls_w (bf16)
            const_spec((1, C)),                                  # cls_b
        ],
        out_specs=pl.BlockSpec((1, TB, C), lambda bt, l: (bt, 0, 0)),
        out_shape=jax.ShapeDtypeStruct((B // TB, TB, C), jnp.float32),
        scratch_shapes=[pltpu.VMEM((TB * S, H), jnp.float32)],   # resident activations
        compiler_params=pltpu.CompilerParams(
            dimension_semantics=("parallel", "arbitrary"),
            # Raised vs v5e's 16 MiB default; at real BERT shapes size this to
            # ~2x the bf16 per-layer weight block set plus residents.
            vmem_limit_bytes=32 * 1024 * 1024),
    )(emb.reshape(B * S, H), mask_bias,
      kparams["emb_ln_g"], kparams["emb_ln_b"],
      kparams["wqkv"], kparams["bqkv"], kparams["wo"], kparams["bo"],
      kparams["ln1_g"], kparams["ln1_b"],
      kparams["w1"], kparams["b1"], kparams["w2"], kparams["b2"],
      kparams["ln2_g"], kparams["ln2_b"],
      kparams["pool_w"], kparams["pool_b"], kparams["cls_w"], kparams["cls_b"])
    return out.reshape(B, C)


# ----------------------------- parameter init (canonical f32, PyTorch semantics) -----------------------------
def init_params(key):
    keys = iter(jax.random.split(key, 32))

    def w(shape, scale=0.02):
        return (scale * jax.random.normal(next(keys), shape)).astype(jnp.float32)

    H, I, L = cfg.hidden, cfg.intermediate, cfg.num_layers
    C = cfg.num_answer_class
    return {
        "word_emb": w((cfg.vocab_size, H)),
        "tok_emb": w((cfg.type_vocab_size, H)),
        "pos_emb": w((cfg.max_position, H)),
        "emb_ln_g": jnp.ones((1, H), jnp.float32),
        "emb_ln_b": jnp.zeros((1, H), jnp.float32),
        # per-layer weights stacked on a leading layer axis (walked by the grid)
        "wqkv": w((L, H, 3 * H)),
        "bqkv": w((L, 1, 3 * H)),
        "wo": w((L, H, H)),
        "bo": w((L, 1, H)),
        "ln1_g": jnp.ones((L, 1, H), jnp.float32),
        "ln1_b": jnp.zeros((L, 1, H), jnp.float32),
        "w1": w((L, H, I)),
        "b1": w((L, 1, I)),
        "w2": w((L, I, H)),
        "b2": w((L, 1, H)),
        "ln2_g": jnp.ones((L, 1, H), jnp.float32),
        "ln2_b": jnp.zeros((L, 1, H), jnp.float32),
        "pool_w": w((H, H)),
        "pool_b": w((1, H)),
        # classifier head: nn.Linear(bert_cls_emb_dim, num_answer_class, bias=True)
        "cls_w": w((cfg.bert_cls_emb_dim, C)),
        "cls_b": w((1, C)),
    }


def prepare_kernel_params(params):
    """One-time host-side transforms for the kernel: fold 1/sqrt(head_dim) into the
    Q columns of the fused QKV weight/bias and cast matmul weights to bf16."""
    H = cfg.hidden
    hd = H // cfg.num_heads
    scale = jnp.float32(1.0 / math.sqrt(hd))
    kp = dict(params)
    kp["wqkv"] = params["wqkv"].at[:, :, :H].multiply(scale).astype(jnp.bfloat16)
    kp["bqkv"] = params["bqkv"].at[:, :, :H].multiply(scale)        # bias stays f32
    for name in ("wo", "w1", "w2", "pool_w", "cls_w"):
        kp[name] = params[name].astype(jnp.bfloat16)
    return kp


# ----------------------------- forward pass (TextModel.forward) -----------------------------
@jax.jit
def text_model_forward(kparams, input_ids, token_ids, attention_mask):
    B, S = input_ids.shape
    # embedding gathers are XLA glue; everything downstream is the fused kernel
    emb = (jnp.take(kparams["word_emb"], input_ids, axis=0)
           + jnp.take(kparams["tok_emb"], token_ids, axis=0)
           + kparams["pos_emb"][:S][None, :, :]).astype(jnp.float32)   # [B, S, H]
    mask_bias = ((1.0 - attention_mask.astype(jnp.float32)) * -1e9).reshape(B, 1, S)
    return fused_text_model(kparams, emb, mask_bias)                   # [B, C]


# ----------------------------- pure-JAX f32 reference (correctness check) -----------------------------
def reference_forward(params, input_ids, token_ids, attention_mask):
    B, S = input_ids.shape
    H, nh = cfg.hidden, cfg.num_heads
    hd = H // nh

    def ln(x, g, b):
        return _layernorm(x, g, b, cfg.ln_eps)

    emb = (jnp.take(params["word_emb"], input_ids, axis=0)
           + jnp.take(params["tok_emb"], token_ids, axis=0)
           + params["pos_emb"][:S][None, :, :])
    x = ln(emb, params["emb_ln_g"][0], params["emb_ln_b"][0])
    bias = ((1.0 - attention_mask.astype(jnp.float32)) * -1e9)[:, None, None, :]
    for l in range(cfg.num_layers):
        qkv = x @ params["wqkv"][l] + params["bqkv"][l][0]
        q, k, v = jnp.split(qkv, 3, axis=-1)
        q = q.reshape(B, S, nh, hd)
        k = k.reshape(B, S, nh, hd)
        v = v.reshape(B, S, nh, hd)
        s = jnp.einsum("bqhd,bkhd->bhqk", q, k) / math.sqrt(hd) + bias
        p = jax.nn.softmax(s, axis=-1)
        ctx = jnp.einsum("bhqk,bkhd->bqhd", p, v).reshape(B, S, H)
        attn_out = ctx @ params["wo"][l] + params["bo"][l][0]
        x = ln(attn_out + x, params["ln1_g"][l][0], params["ln1_b"][l][0])
        ffn = _gelu_tanh(x @ params["w1"][l] + params["b1"][l][0])
        x = ln(ffn @ params["w2"][l] + params["b2"][l][0] + x,
               params["ln2_g"][l][0], params["ln2_b"][l][0])
    pooled = jnp.tanh(x[:, 0, :] @ params["pool_w"] + params["pool_b"][0])
    return pooled @ params["cls_w"] + params["cls_b"][0]


# ----------------------------- main -----------------------------
if __name__ == "__main__":
    key = jax.random.PRNGKey(0)
    pkey, ikey, tkey = jax.random.split(key, 3)

    params = init_params(pkey)                 # canonical f32 (PyTorch semantics)
    kparams = prepare_kernel_params(params)    # bf16 + folded-scale kernel weights

    input_ids = jax.random.randint(ikey, (cfg.batch, cfg.seq), 0, cfg.vocab_size,
                                   dtype=jnp.int32)
    token_ids = jax.random.randint(tkey, (cfg.batch, cfg.seq), 0, cfg.type_vocab_size,
                                   dtype=jnp.int32)
    attention_mask = jnp.ones((cfg.batch, cfg.seq), dtype=jnp.int32).at[:, -2:].set(0)

    logits = text_model_forward(kparams, input_ids, token_ids, attention_mask)
    jax.block_until_ready(logits)
    assert logits.shape == (cfg.batch, cfg.num_answer_class)
    assert bool(jnp.all(jnp.isfinite(logits)))

    ref = reference_forward(params, input_ids, token_ids, attention_mask)
    max_diff = float(jnp.max(jnp.abs(logits - ref)))
    # bf16 matmul operands + approx reciprocal vs exact-f32 reference -> loose tol.
    assert max_diff < 2e-2, f"mismatch vs pure-JAX reference: {max_diff}"

    print("KERNEL_OK")
</pallas_src>

<mosaic_0001>
module attributes {stable_mosaic.version = 11 : i64} {
  func.func @_fused_text_kernel(%arg0: i32, %arg1: i32, %arg2: memref<16x32xf32, #tpu.memory_space<vmem>>, %arg3: memref<2x1x8xf32, #tpu.memory_space<vmem>>, %arg4: memref<1x32xf32, #tpu.memory_space<vmem>>, %arg5: memref<1x32xf32, #tpu.memory_space<vmem>>, %arg6: memref<1x32x96xbf16, #tpu.memory_space<vmem>>, %arg7: memref<1x1x96xf32, #tpu.memory_space<vmem>>, %arg8: memref<1x32x32xbf16, #tpu.memory_space<vmem>>, %arg9: memref<1x1x32xf32, #tpu.memory_space<vmem>>, %arg10: memref<1x1x32xf32, #tpu.memory_space<vmem>>, %arg11: memref<1x1x32xf32, #tpu.memory_space<vmem>>, %arg12: memref<1x32x64xbf16, #tpu.memory_space<vmem>>, %arg13: memref<1x1x64xf32, #tpu.memory_space<vmem>>, %arg14: memref<1x64x32xbf16, #tpu.memory_space<vmem>>, %arg15: memref<1x1x32xf32, #tpu.memory_space<vmem>>, %arg16: memref<1x1x32xf32, #tpu.memory_space<vmem>>, %arg17: memref<1x1x32xf32, #tpu.memory_space<vmem>>, %arg18: memref<32x32xbf16, #tpu.memory_space<vmem>>, %arg19: memref<1x32xf32, #tpu.memory_space<vmem>>, %arg20: memref<32x4xbf16, #tpu.memory_space<vmem>>, %arg21: memref<1x4xf32, #tpu.memory_space<vmem>>, %arg22: memref<1x2x4xf32, #tpu.memory_space<vmem>>, %arg23: memref<16x32xf32, #tpu.memory_space<vmem>>) attributes {dimension_semantics = [#tpu.dimension_semantics<parallel>, #tpu.dimension_semantics<arbitrary>], iteration_bounds = array<i64: 1, 2>, scalar_prefetch = 0 : i64, scratch_operands = 1 : i64, tpu.core_type = #tpu.core_type<tc>, window_params = [{transform_indices = @transform_0, window_bounds = array<i64: 16, 32>}, {transform_indices = @transform_1, window_bounds = array<i64: 2, 1, 8>}, {pipeline_mode = #tpu.pipeline_mode<synchronous>, transform_indices = @transform_2, window_bounds = array<i64: 1, 32>}, {pipeline_mode = #tpu.pipeline_mode<synchronous>, transform_indices = @transform_3, window_bounds = array<i64: 1, 32>}, {transform_indices = @transform_4, window_bounds = array<i64: 1, 32, 96>}, {transform_indices = @transform_5, window_bounds = array<i64: 1, 1, 96>}, {transform_indices = @transform_6, window_bounds = array<i64: 1, 32, 32>}, {transform_indices = @transform_7, window_bounds = array<i64: 1, 1, 32>}, {transform_indices = @transform_8, window_bounds = array<i64: 1, 1, 32>}, {transform_indices = @transform_9, window_bounds = array<i64: 1, 1, 32>}, {transform_indices = @transform_10, window_bounds = array<i64: 1, 32, 64>}, {transform_indices = @transform_11, window_bounds = array<i64: 1, 1, 64>}, {transform_indices = @transform_12, window_bounds = array<i64: 1, 64, 32>}, {transform_indices = @transform_13, window_bounds = array<i64: 1, 1, 32>}, {transform_indices = @transform_14, window_bounds = array<i64: 1, 1, 32>}, {transform_indices = @transform_15, window_bounds = array<i64: 1, 1, 32>}, {pipeline_mode = #tpu.pipeline_mode<synchronous>, transform_indices = @transform_16, window_bounds = array<i64: 32, 32>}, {pipeline_mode = #tpu.pipeline_mode<synchronous>, transform_indices = @transform_17, window_bounds = array<i64: 1, 32>}, {pipeline_mode = #tpu.pipeline_mode<synchronous>, transform_indices = @transform_18, window_bounds = array<i64: 32, 4>}, {pipeline_mode = #tpu.pipeline_mode<synchronous>, transform_indices = @transform_19, window_bounds = array<i64: 1, 4>}, {transform_indices = @transform_20, window_bounds = array<i64: 1, 2, 4>}]} {
    %c0_i32 = arith.constant 0 : i32
    %0 = arith.cmpi eq, %arg1, %c0_i32 : i32
    %1 = arith.extui %0 : i1 to i32
    %c0_i32_0 = arith.constant 0 : i32
    %2 = arith.cmpi ne, %1, %c0_i32_0 : i32
    scf.if %2 {
      %c0_84 = arith.constant 0 : index
      %c0_85 = arith.constant 0 : index
      %210 = vector.load %arg2[%c0_84, %c0_85] : memref<16x32xf32, #tpu.memory_space<vmem>>, vector<16x32xf32>
      %c0_86 = arith.constant 0 : index
      %c0_87 = arith.constant 0 : index
      %211 = vector.load %arg4[%c0_86, %c0_87] : memref<1x32xf32, #tpu.memory_space<vmem>>, vector<1x32xf32>
      %c0_88 = arith.constant 0 : index
      %c0_89 = arith.constant 0 : index
      %212 = vector.load %arg5[%c0_88, %c0_89] : memref<1x32xf32, #tpu.memory_space<vmem>>, vector<1x32xf32>
      %cst_90 = arith.constant dense<0.000000e+00> : vector<16xf32>
      %213 = vector.multi_reduction <add>, %210, %cst_90 [1] : vector<16x32xf32> to vector<16xf32>
      %214 = vector.shape_cast %213 : vector<16xf32> to vector<16x1xf32>
      %cst_91 = arith.constant 3.200000e+01 : f32
      %215 = vector.broadcast %cst_91 : f32 to vector<16x1xf32>
      %216 = arith.divf %214, %215 : vector<16x1xf32>
      %217 = vector.broadcast %216 : vector<16x1xf32> to vector<16x32xf32>
      %218 = arith.subf %210, %217 : vector<16x32xf32>
      %219 = arith.mulf %218, %218 : vector<16x32xf32>
      %cst_92 = arith.constant dense<0.000000e+00> : vector<16xf32>
      %220 = vector.multi_reduction <add>, %219, %cst_92 [1] : vector<16x32xf32> to vector<16xf32>
      %221 = vector.shape_cast %220 : vector<16xf32> to vector<16x1xf32>
      %cst_93 = arith.constant 3.200000e+01 : f32
      %222 = vector.broadcast %cst_93 : f32 to vector<16x1xf32>
      %223 = arith.divf %221, %222 : vector<16x1xf32>
      %cst_94 = arith.constant 9.99999996E-13 : f32
      %224 = vector.broadcast %cst_94 : f32 to vector<16x1xf32>
      %225 = arith.addf %223, %224 : vector<16x1xf32>
      %226 = math.rsqrt %225 : vector<16x1xf32>
      %227 = vector.broadcast %226 : vector<16x1xf32> to vector<16x32xf32>
      %228 = arith.mulf %218, %227 : vector<16x32xf32>
      %229 = vector.broadcast %211 : vector<1x32xf32> to vector<16x32xf32>
      %230 = arith.mulf %228, %229 : vector<16x32xf32>
      %231 = vector.broadcast %212 : vector<1x32xf32> to vector<16x32xf32>
      %232 = arith.addf %230, %231 : vector<16x32xf32>
      %c0_95 = arith.constant 0 : index
      %c0_96 = arith.constant 0 : index
      %233 = vector.load %arg23[%c0_95, %c0_96] : memref<16x32xf32, #tpu.memory_space<vmem>>, vector<16x32xf32>
      tpu.vector_store %arg23[%c0_95, %c0_96], %232 {strides = array<i32>} : memref<16x32xf32, #tpu.memory_space<vmem>>, vector<16x32xf32>,
    } else {
    }
    %c0 = arith.constant 0 : index
    %c0_1 = arith.constant 0 : index
    %3 = vector.load %arg23[%c0, %c0_1] : memref<16x32xf32, #tpu.memory_space<vmem>>, vector<16x32xf32>
    %4 = arith.truncf %3 : vector<16x32xf32> to vector<16x32xbf16>
    %c0_2 = arith.constant 0 : index
    %c0_3 = arith.constant 0 : index
    %c0_4 = arith.constant 0 : index
    %5 = vector.load %arg6[%c0_2, %c0_3, %c0_4] : memref<1x32x96xbf16, #tpu.memory_space<vmem>>, vector<1x32x96xbf16>
    %6 = vector.shape_cast %5 : vector<1x32x96xbf16> to vector<32x96xbf16>
    %cst = arith.constant dense<0.000000e+00> : vector<16x96xf32>
    %7 = tpu.matmul %4, %6, %cst {dimension_numbers = #tpu.dot_dimension_numbers<[1], [0], [0], [1], [0, 0, 1, 1], [], []>} : vector<16x32xbf16>, vector<32x96xbf16>, vector<16x96xf32> -> vector<16x96xf32>
    %c0_5 = arith.constant 0 : index
    %c0_6 = arith.constant 0 : index
    %c0_7 = arith.constant 0 : index
    %8 = vector.load %arg7[%c0_5, %c0_6, %c0_7] : memref<1x1x96xf32, #tpu.memory_space<vmem>>, vector<1x1x96xf32>
    %9 = vector.shape_cast %8 : vector<1x1x96xf32> to vector<1x96xf32>
    %10 = vector.broadcast %9 : vector<1x96xf32> to vector<16x96xf32>
    %11 = arith.addf %7, %10 : vector<16x96xf32>
    %c0_8 = arith.constant 0 : index
    %c0_9 = arith.constant 0 : index
    %c0_10 = arith.constant 0 : index
    %12 = vector.load %arg8[%c0_8, %c0_9, %c0_10] : memref<1x32x32xbf16, #tpu.memory_space<vmem>>, vector<1x32x32xbf16>
    %13 = vector.shape_cast %12 : vector<1x32x32xbf16> to vector<32x32xbf16>
    %14 = vector.extract_strided_slice %11 {offsets = [0, 0], sizes = [8, 96], strides = [1, 1]} : vector<16x96xf32> to vector<8x96xf32>
    %c0_11 = arith.constant 0 : index
    %c0_12 = arith.constant 0 : index
    %c0_13 = arith.constant 0 : index
    %15 = vector.load %arg3[%c0_11, %c0_12, %c0_13] : memref<2x1x8xf32, #tpu.memory_space<vmem>>, vector<1x1x8xf32>
    %16 = vector.shape_cast %15 : vector<1x1x8xf32> to vector<1x8xf32>
    %cst_14 = arith.constant 0.000000e+00 : f32
    %17 = vector.broadcast %cst_14 : f32 to vector<8x32xf32>
    %18 = vector.extract_strided_slice %14 {offsets = [0, 0], sizes = [8, 16], strides = [1, 1]} : vector<8x96xf32> to vector<8x16xf32>
    %19 = arith.truncf %18 : vector<8x16xf32> to vector<8x16xbf16>
    %20 = vector.extract_strided_slice %14 {offsets = [0, 32], sizes = [8, 16], strides = [1, 1]} : vector<8x96xf32> to vector<8x16xf32>
    %21 = arith.truncf %20 : vector<8x16xf32> to vector<8x16xbf16>
    %22 = vector.extract_strided_slice %14 {offsets = [0, 64], sizes = [8, 16], strides = [1, 1]} : vector<8x96xf32> to vector<8x16xf32>
    %23 = arith.truncf %22 : vector<8x16xf32> to vector<8x16xbf16>
    %cst_15 = arith.constant dense<0.000000e+00> : vector<8x8xf32>
    %24 = tpu.matmul %19, %21, %cst_15 {dimension_numbers = #tpu.dot_dimension_numbers<[1], [1], [0], [0], [0, 0, 1, 0], [], []>} : vector<8x16xbf16>, vector<8x16xbf16>, vector<8x8xf32> -> vector<8x8xf32>
    %25 = vector.broadcast %16 : vector<1x8xf32> to vector<8x8xf32>
    %26 = arith.addf %24, %25 : vector<8x8xf32>
    %cst_16 = arith.constant dense<0xFF800000> : vector<8xf32>
    %27 = vector.multi_reduction <maximumf>, %26, %cst_16 [1] : vector<8x8xf32> to vector<8xf32>
    %28 = vector.shape_cast %27 : vector<8xf32> to vector<8x1xf32>
    %29 = vector.broadcast %28 : vector<8x1xf32> to vector<8x8xf32>
    %30 = arith.subf %26, %29 : vector<8x8xf32>
    %31 = math.exp %30 : vector<8x8xf32>
    %cst_17 = arith.constant dense<0.000000e+00> : vector<8xf32>
    %32 = vector.multi_reduction <add>, %31, %cst_17 [1] : vector<8x8xf32> to vector<8xf32>
    %33 = vector.shape_cast %32 : vector<8xf32> to vector<8x1xf32>
    %34 = tpu.reciprocal %33 {approx = true} : vector<8x1xf32> -> vector<8x1xf32>
    %35 = vector.broadcast %34 : vector<8x1xf32> to vector<8x8xf32>
    %36 = arith.mulf %31, %35 : vector<8x8xf32>
    %37 = arith.truncf %36 : vector<8x8xf32> to vector<8x8xbf16>
    %cst_18 = arith.constant dense<0.000000e+00> : vector<8x16xf32>
    %38 = tpu.matmul %37, %23, %cst_18 {dimension_numbers = #tpu.dot_dimension_numbers<[1], [0], [0], [1], [0, 0, 1, 1], [], []>} : vector<8x8xbf16>, vector<8x16xbf16>, vector<8x16xf32> -> vector<8x16xf32>
    %39 = arith.truncf %38 : vector<8x16xf32> to vector<8x16xbf16>
    %40 = vector.extract_strided_slice %13 {offsets = [0, 0], sizes = [16, 32], strides = [1, 1]} : vector<32x32xbf16> to vector<16x32xbf16>
    %cst_19 = arith.constant dense<0.000000e+00> : vector<8x32xf32>
    %41 = tpu.matmul %39, %40, %cst_19 {dimension_numbers = #tpu.dot_dimension_numbers<[1], [0], [0], [1], [0, 0, 1, 1], [], []>} : vector<8x16xbf16>, vector<16x32xbf16>, vector<8x32xf32> -> vector<8x32xf32>
    %42 = arith.addf %17, %41 : vector<8x32xf32>
    %43 = vector.extract_strided_slice %14 {offsets = [0, 16], sizes = [8, 16], strides = [1, 1]} : vector<8x96xf32> to vector<8x16xf32>
    %44 = arith.truncf %43 : vector<8x16xf32> to vector<8x16xbf16>
    %45 = vector.extract_strided_slice %14 {offsets = [0, 48], sizes = [8, 16], strides = [1, 1]} : vector<8x96xf32> to vector<8x16xf32>
    %46 = arith.truncf %45 : vector<8x16xf32> to vector<8x16xbf16>
    %47 = vector.extract_strided_slice %14 {offsets = [0, 80], sizes = [8, 16], strides = [1, 1]} : vector<8x96xf32> to vector<8x16xf32>
    %48 = arith.truncf %47 : vector<8x16xf32> to vector<8x16xbf16>
    %cst_20 = arith.constant dense<0.000000e+00> : vector<8x8xf32>
    %49 = tpu.matmul %44, %46, %cst_20 {dimension_numbers = #tpu.dot_dimension_numbers<[1], [1], [0], [0], [0, 0, 1, 0], [], []>} : vector<8x16xbf16>, vector<8x16xbf16>, vector<8x8xf32> -> vector<8x8xf32>
    %50 = vector.broadcast %16 : vector<1x8xf32> to vector<8x8xf32>
    %51 = arith.addf %49, %50 : vector<8x8xf32>
    %cst_21 = arith.constant dense<0xFF800000> : vector<8xf32>
    %52 = vector.multi_reduction <maximumf>, %51, %cst_21 [1] : vector<8x8xf32> to vector<8xf32>
    %53 = vector.shape_cast %52 : vector<8xf32> to vector<8x1xf32>
    %54 = vector.broadcast %53 : vector<8x1xf32> to vector<8x8xf32>
    %55 = arith.subf %51, %54 : vector<8x8xf32>
    %56 = math.exp %55 : vector<8x8xf32>
    %cst_22 = arith.constant dense<0.000000e+00> : vector<8xf32>
    %57 = vector.multi_reduction <add>, %56, %cst_22 [1] : vector<8x8xf32> to vector<8xf32>
    %58 = vector.shape_cast %57 : vector<8xf32> to vector<8x1xf32>
    %59 = tpu.reciprocal %58 {approx = true} : vector<8x1xf32> -> vector<8x1xf32>
    %60 = vector.broadcast %59 : vector<8x1xf32> to vector<8x8xf32>
    %61 = arith.mulf %56, %60 : vector<8x8xf32>
    %62 = arith.truncf %61 : vector<8x8xf32> to vector<8x8xbf16>
    %cst_23 = arith.constant dense<0.000000e+00> : vector<8x16xf32>
    %63 = tpu.matmul %62, %48, %cst_23 {dimension_numbers = #tpu.dot_dimension_numbers<[1], [0], [0], [1], [0, 0, 1, 1], [], []>} : vector<8x8xbf16>, vector<8x16xbf16>, vector<8x16xf32> -> vector<8x16xf32>
    %64 = arith.truncf %63 : vector<8x16xf32> to vector<8x16xbf16>
    %65 = vector.extract_strided_slice %13 {offsets = [16, 0], sizes = [16, 32], strides = [1, 1]} : vector<32x32xbf16> to vector<16x32xbf16>
    %cst_24 = arith.constant dense<0.000000e+00> : vector<8x32xf32>
    %66 = tpu.matmul %64, %65, %cst_24 {dimension_numbers = #tpu.dot_dimension_numbers<[1], [0], [0], [1], [0, 0, 1, 1], [], []>} : vector<8x16xbf16>, vector<16x32xbf16>, vector<8x32xf32> -> vector<8x32xf32>
    %67 = arith.addf %42, %66 : vector<8x32xf32>
    %68 = vector.extract_strided_slice %11 {offsets = [8, 0], sizes = [8, 96], strides = [1, 1]} : vector<16x96xf32> to vector<8x96xf32>
    %c1 = arith.constant 1 : index
    %c0_25 = arith.constant 0 : index
    %c0_26 = arith.constant 0 : index
    %69 = vector.load %arg3[%c1, %c0_25, %c0_26] : memref<2x1x8xf32, #tpu.memory_space<vmem>>, vector<1x1x8xf32>
    %70 = vector.shape_cast %69 : vector<1x1x8xf32> to vector<1x8xf32>
    %cst_27 = arith.constant 0.000000e+00 : f32
    %71 = vector.broadcast %cst_27 : f32 to vector<8x32xf32>
    %72 = vector.extract_strided_slice %68 {offsets = [0, 0], sizes = [8, 16], strides = [1, 1]} : vector<8x96xf32> to vector<8x16xf32>
    %73 = arith.truncf %72 : vector<8x16xf32> to vector<8x16xbf16>
    %74 = vector.extract_strided_slice %68 {offsets = [0, 32], sizes = [8, 16], strides = [1, 1]} : vector<8x96xf32> to vector<8x16xf32>
    %75 = arith.truncf %74 : vector<8x16xf32> to vector<8x16xbf16>
    %76 = vector.extract_strided_slice %68 {offsets = [0, 64], sizes = [8, 16], strides = [1, 1]} : vector<8x96xf32> to vector<8x16xf32>
    %77 = arith.truncf %76 : vector<8x16xf32> to vector<8x16xbf16>
    %cst_28 = arith.constant dense<0.000000e+00> : vector<8x8xf32>
    %78 = tpu.matmul %73, %75, %cst_28 {dimension_numbers = #tpu.dot_dimension_numbers<[1], [1], [0], [0], [0, 0, 1, 0], [], []>} : vector<8x16xbf16>, vector<8x16xbf16>, vector<8x8xf32> -> vector<8x8xf32>
    %79 = vector.broadcast %70 : vector<1x8xf32> to vector<8x8xf32>
    %80 = arith.addf %78, %79 : vector<8x8xf32>
    %cst_29 = arith.constant dense<0xFF800000> : vector<8xf32>
    %81 = vector.multi_reduction <maximumf>, %80, %cst_29 [1] : vector<8x8xf32> to vector<8xf32>
    %82 = vector.shape_cast %81 : vector<8xf32> to vector<8x1xf32>
    %83 = vector.broadcast %82 : vector<8x1xf32> to vector<8x8xf32>
    %84 = arith.subf %80, %83 : vector<8x8xf32>
    %85 = math.exp %84 : vector<8x8xf32>
    %cst_30 = arith.constant dense<0.000000e+00> : vector<8xf32>
    %86 = vector.multi_reduction <add>, %85, %cst_30 [1] : vector<8x8xf32> to vector<8xf32>
    %87 = vector.shape_cast %86 : vector<8xf32> to vector<8x1xf32>
    %88 = tpu.reciprocal %87 {approx = true} : vector<8x1xf32> -> vector<8x1xf32>
    %89 = vector.broadcast %88 : vector<8x1xf32> to vector<8x8xf32>
    %90 = arith.mulf %85, %89 : vector<8x8xf32>
    %91 = arith.truncf %90 : vector<8x8xf32> to vector<8x8xbf16>
    %cst_31 = arith.constant dense<0.000000e+00> : vector<8x16xf32>
    %92 = tpu.matmul %91, %77, %cst_31 {dimension_numbers = #tpu.dot_dimension_numbers<[1], [0], [0], [1], [0, 0, 1, 1], [], []>} : vector<8x8xbf16>, vector<8x16xbf16>, vector<8x16xf32> -> vector<8x16xf32>
    %93 = arith.truncf %92 : vector<8x16xf32> to vector<8x16xbf16>
    %94 = vector.extract_strided_slice %13 {offsets = [0, 0], sizes = [16, 32], strides = [1, 1]} : vector<32x32xbf16> to vector<16x32xbf16>
    %cst_32 = arith.constant dense<0.000000e+00> : vector<8x32xf32>
    %95 = tpu.matmul %93, %94, %cst_32 {dimension_numbers = #tpu.dot_dimension_numbers<[1], [0], [0], [1], [0, 0, 1, 1], [], []>} : vector<8x16xbf16>, vector<16x32xbf16>, vector<8x32xf32> -> vector<8x32xf32>
    %96 = arith.addf %71, %95 : vector<8x32xf32>
    %97 = vector.extract_strided_slice %68 {offsets = [0, 16], sizes = [8, 16], strides = [1, 1]} : vector<8x96xf32> to vector<8x16xf32>
    %98 = arith.truncf %97 : vector<8x16xf32> to vector<8x16xbf16>
    %99 = vector.extract_strided_slice %68 {offsets = [0, 48], sizes = [8, 16], strides = [1, 1]} : vector<8x96xf32> to vector<8x16xf32>
    %100 = arith.truncf %99 : vector<8x16xf32> to vector<8x16xbf16>
    %101 = vector.extract_strided_slice %68 {offsets = [0, 80], sizes = [8, 16], strides = [1, 1]} : vector<8x96xf32> to vector<8x16xf32>
    %102 = arith.truncf %101 : vector<8x16xf32> to vector<8x16xbf16>
    %cst_33 = arith.constant dense<0.000000e+00> : vector<8x8xf32>
    %103 = tpu.matmul %98, %100, %cst_33 {dimension_numbers = #tpu.dot_dimension_numbers<[1], [1], [0], [0], [0, 0, 1, 0], [], []>} : vector<8x16xbf16>, vector<8x16xbf16>, vector<8x8xf32> -> vector<8x8xf32>
    %104 = vector.broadcast %70 : vector<1x8xf32> to vector<8x8xf32>
    %105 = arith.addf %103, %104 : vector<8x8xf32>
    %cst_34 = arith.constant dense<0xFF800000> : vector<8xf32>
    %106 = vector.multi_reduction <maximumf>, %105, %cst_34 [1] : vector<8x8xf32> to vector<8xf32>
    %107 = vector.shape_cast %106 : vector<8xf32> to vector<8x1xf32>
    %108 = vector.broadcast %107 : vector<8x1xf32> to vector<8x8xf32>
    %109 = arith.subf %105, %108 : vector<8x8xf32>
    %110 = math.exp %109 : vector<8x8xf32>
    %cst_35 = arith.constant dense<0.000000e+00> : vector<8xf32>
    %111 = vector.multi_reduction <add>, %110, %cst_35 [1] : vector<8x8xf32> to vector<8xf32>
    %112 = vector.shape_cast %111 : vector<8xf32> to vector<8x1xf32>
    %113 = tpu.reciprocal %112 {approx = true} : vector<8x1xf32> -> vector<8x1xf32>
    %114 = vector.broadcast %113 : vector<8x1xf32> to vector<8x8xf32>
    %115 = arith.mulf %110, %114 : vector<8x8xf32>
    %116 = arith.truncf %115 : vector<8x8xf32> to vector<8x8xbf16>
    %cst_36 = arith.constant dense<0.000000e+00> : vector<8x16xf32>
    %117 = tpu.matmul %116, %102, %cst_36 {dimension_numbers = #tpu.dot_dimension_numbers<[1], [0], [0], [1], [0, 0, 1, 1], [], []>} : vector<8x8xbf16>, vector<8x16xbf16>, vector<8x16xf32> -> vector<8x16xf32>
    %118 = arith.truncf %117 : vector<8x16xf32> to vector<8x16xbf16>
    %119 = vector.extract_strided_slice %13 {offsets = [16, 0], sizes = [16, 32], strides = [1, 1]} : vector<32x32xbf16> to vector<16x32xbf16>
    %cst_37 = arith.constant dense<0.000000e+00> : vector<8x32xf32>
    %120 = tpu.matmul %118, %119, %cst_37 {dimension_numbers = #tpu.dot_dimension_numbers<[1], [0], [0], [1], [0, 0, 1, 1], [], []>} : vector<8x16xbf16>, vector<16x32xbf16>, vector<8x32xf32> -> vector<8x32xf32>
    %121 = arith.addf %96, %120 : vector<8x32xf32>
    %122 = tpu.concatenate %67, %121 in 0 : vector<8x32xf32>, vector<8x32xf32> -> vector<16x32xf32>
    %c0_38 = arith.constant 0 : index
    %c0_39 = arith.constant 0 : index
    %c0_40 = arith.constant 0 : index
    %123 = vector.load %arg9[%c0_38, %c0_39, %c0_40] : memref<1x1x32xf32, #tpu.memory_space<vmem>>, vector<1x1x32xf32>
    %124 = vector.shape_cast %123 : vector<1x1x32xf32> to vector<1x32xf32>
    %125 = vector.broadcast %124 : vector<1x32xf32> to vector<16x32xf32>
    %126 = arith.addf %122, %125 : vector<16x32xf32>
    %127 = arith.addf %126, %3 : vector<16x32xf32>
    %c0_41 = arith.constant 0 : index
    %c0_42 = arith.constant 0 : index
    %c0_43 = arith.constant 0 : index
    %128 = vector.load %arg10[%c0_41, %c0_42, %c0_43] : memref<1x1x32xf32, #tpu.memory_space<vmem>>, vector<1x1x32xf32>
    %129 = vector.shape_cast %128 : vector<1x1x32xf32> to vector<1x32xf32>
    %c0_44 = arith.constant 0 : index
    %c0_45 = arith.constant 0 : index
    %c0_46 = arith.constant 0 : index
    %130 = vector.load %arg11[%c0_44, %c0_45, %c0_46] : memref<1x1x32xf32, #tpu.memory_space<vmem>>, vector<1x1x32xf32>
    %131 = vector.shape_cast %130 : vector<1x1x32xf32> to vector<1x32xf32>
    %cst_47 = arith.constant dense<0.000000e+00> : vector<16xf32>
    %132 = vector.multi_reduction <add>, %127, %cst_47 [1] : vector<16x32xf32> to vector<16xf32>
    %133 = vector.shape_cast %132 : vector<16xf32> to vector<16x1xf32>
    %cst_48 = arith.constant 3.200000e+01 : f32
    %134 = vector.broadcast %cst_48 : f32 to vector<16x1xf32>
    %135 = arith.divf %133, %134 : vector<16x1xf32>
    %136 = vector.broadcast %135 : vector<16x1xf32> to vector<16x32xf32>
    %137 = arith.subf %127, %136 : vector<16x32xf32>
    %138 = arith.mulf %137, %137 : vector<16x32xf32>
    %cst_49 = arith.constant dense<0.000000e+00> : vector<16xf32>
    %139 = vector.multi_reduction <add>, %138, %cst_49 [1] : vector<16x32xf32> to vector<16xf32>
    %140 = vector.shape_cast %139 : vector<16xf32> to vector<16x1xf32>
    %cst_50 = arith.constant 3.200000e+01 : f32
    %141 = vector.broadcast %cst_50 : f32 to vector<16x1xf32>
    %142 = arith.divf %140, %141 : vector<16x1xf32>
    %cst_51 = arith.constant 9.99999996E-13 : f32
    %143 = vector.broadcast %cst_51 : f32 to vector<16x1xf32>
    %144 = arith.addf %142, %143 : vector<16x1xf32>
    %145 = math.rsqrt %144 : vector<16x1xf32>
    %146 = vector.broadcast %145 : vector<16x1xf32> to vector<16x32xf32>
    %147 = arith.mulf %137, %146 : vector<16x32xf32>
    %148 = vector.broadcast %129 : vector<1x32xf32> to vector<16x32xf32>
    %149 = arith.mulf %147, %148 : vector<16x32xf32>
    %150 = vector.broadcast %131 : vector<1x32xf32> to vector<16x32xf32>
    %151 = arith.addf %149, %150 : vector<16x32xf32>
    %152 = arith.truncf %151 : vector<16x32xf32> to vector<16x32xbf16>
    %c0_52 = arith.constant 0 : index
    %c0_53 = arith.constant 0 : index
    %c0_54 = arith.constant 0 : index
    %153 = vector.load %arg12[%c0_52, %c0_53, %c0_54] : memref<1x32x64xbf16, #tpu.memory_space<vmem>>, vector<1x32x64xbf16>
    %154 = vector.shape_cast %153 : vector<1x32x64xbf16> to vector<32x64xbf16>
    %cst_55 = arith.constant dense<0.000000e+00> : vector<16x64xf32>
    %155 = tpu.matmul %152, %154, %cst_55 {dimension_numbers = #tpu.dot_dimension_numbers<[1], [0], [0], [1], [0, 0, 1, 1], [], []>} : vector<16x32xbf16>, vector<32x64xbf16>, vector<16x64xf32> -> vector<16x64xf32>
    %c0_56 = arith.constant 0 : index
    %c0_57 = arith.constant 0 : index
    %c0_58 = arith.constant 0 : index
    %156 = vector.load %arg13[%c0_56, %c0_57, %c0_58] : memref<1x1x64xf32, #tpu.memory_space<vmem>>, vector<1x1x64xf32>
    %157 = vector.shape_cast %156 : vector<1x1x64xf32> to vector<1x64xf32>
    %158 = vector.broadcast %157 : vector<1x64xf32> to vector<16x64xf32>
    %159 = arith.addf %155, %158 : vector<16x64xf32>
    %cst_59 = arith.constant 5.000000e-01 : f32
    %160 = vector.broadcast %cst_59 : f32 to vector<16x64xf32>
    %161 = arith.mulf %160, %159 : vector<16x64xf32>
    %cst_60 = arith.constant 4.471500e-02 : f32
    %162 = vector.broadcast %cst_60 : f32 to vector<16x64xf32>
    %163 = arith.mulf %162, %159 : vector<16x64xf32>
    %164 = arith.mulf %163, %159 : vector<16x64xf32>
    %165 = arith.mulf %164, %159 : vector<16x64xf32>
    %166 = arith.addf %159, %165 : vector<16x64xf32>
    %cst_61 = arith.constant 0.797884583 : f32
    %167 = vector.broadcast %cst_61 : f32 to vector<16x64xf32>
    %168 = arith.mulf %167, %166 : vector<16x64xf32>
    %169 = math.tanh %168 : vector<16x64xf32>
    %cst_62 = arith.constant 1.000000e+00 : f32
    %170 = vector.broadcast %cst_62 : f32 to vector<16x64xf32>
    %171 = arith.addf %170, %169 : vector<16x64xf32>
    %172 = arith.mulf %161, %171 : vector<16x64xf32>
    %173 = arith.truncf %172 : vector<16x64xf32> to vector<16x64xbf16>
    %c0_63 = arith.constant 0 : index
    %c0_64 = arith.constant 0 : index
    %c0_65 = arith.constant 0 : index
    %174 = vector.load %arg14[%c0_63, %c0_64, %c0_65] : memref<1x64x32xbf16, #tpu.memory_space<vmem>>, vector<1x64x32xbf16>
    %175 = vector.shape_cast %174 : vector<1x64x32xbf16> to vector<64x32xbf16>
    %cst_66 = arith.constant dense<0.000000e+00> : vector<16x32xf32>
    %176 = tpu.matmul %173, %175, %cst_66 {dimension_numbers = #tpu.dot_dimension_numbers<[1], [0], [0], [1], [0, 0, 1, 1], [], []>} : vector<16x64xbf16>, vector<64x32xbf16>, vector<16x32xf32> -> vector<16x32xf32>
    %c0_67 = arith.constant 0 : index
    %c0_68 = arith.constant 0 : index
    %c0_69 = arith.constant 0 : index
    %177 = vector.load %arg15[%c0_67, %c0_68, %c0_69] : memref<1x1x32xf32, #tpu.memory_space<vmem>>, vector<1x1x32xf32>
    %178 = vector.shape_cast %177 : vector<1x1x32xf32> to vector<1x32xf32>
    %179 = vector.broadcast %178 : vector<1x32xf32> to vector<16x32xf32>
    %180 = arith.addf %176, %179 : vector<16x32xf32>
    %181 = arith.addf %180, %151 : vector<16x32xf32>
    %c0_70 = arith.constant 0 : index
    %c0_71 = arith.constant 0 : index
    %c0_72 = arith.constant 0 : index
    %182 = vector.load %arg16[%c0_70, %c0_71, %c0_72] : memref<1x1x32xf32, #tpu.memory_space<vmem>>, vector<1x1x32xf32>
    %183 = vector.shape_cast %182 : vector<1x1x32xf32> to vector<1x32xf32>
    %c0_73 = arith.constant 0 : index
    %c0_74 = arith.constant 0 : index
    %c0_75 = arith.constant 0 : index
    %184 = vector.load %arg17[%c0_73, %c0_74, %c0_75] : memref<1x1x32xf32, #tpu.memory_space<vmem>>, vector<1x1x32xf32>
    %185 = vector.shape_cast %184 : vector<1x1x32xf32> to vector<1x32xf32>
    %cst_76 = arith.constant dense<0.000000e+00> : vector<16xf32>
    %186 = vector.multi_reduction <add>, %181, %cst_76 [1] : vector<16x32xf32> to vector<16xf32>
    %187 = vector.shape_cast %186 : vector<16xf32> to vector<16x1xf32>
    %cst_77 = arith.constant 3.200000e+01 : f32
    %188 = vector.broadcast %cst_77 : f32 to vector<16x1xf32>
    %189 = arith.divf %187, %188 : vector<16x1xf32>
    %190 = vector.broadcast %189 : vector<16x1xf32> to vector<16x32xf32>
    %191 = arith.subf %181, %190 : vector<16x32xf32>
    %192 = arith.mulf %191, %191 : vector<16x32xf32>
    %cst_78 = arith.constant dense<0.000000e+00> : vector<16xf32>
    %193 = vector.multi_reduction <add>, %192, %cst_78 [1] : vector<16x32xf32> to vector<16xf32>
    %194 = vector.shape_cast %193 : vector<16xf32> to vector<16x1xf32>
    %cst_79 = arith.constant 3.200000e+01 : f32
    %195 = vector.broadcast %cst_79 : f32 to vector<16x1xf32>
    %196 = arith.divf %194, %195 : vector<16x1xf32>
    %cst_80 = arith.constant 9.99999996E-13 : f32
    %197 = vector.broadcast %cst_80 : f32 to vector<16x1xf32>
    %198 = arith.addf %196, %197 : vector<16x1xf32>
    %199 = math.rsqrt %198 : vector<16x1xf32>
    %200 = vector.broadcast %199 : vector<16x1xf32> to vector<16x32xf32>
    %201 = arith.mulf %191, %200 : vector<16x32xf32>
    %202 = vector.broadcast %183 : vector<1x32xf32> to vector<16x32xf32>
    %203 = arith.mulf %201, %202 : vector<16x32xf32>
    %204 = vector.broadcast %185 : vector<1x32xf32> to vector<16x32xf32>
    %205 = arith.addf %203, %204 : vector<16x32xf32>
    %c0_81 = arith.constant 0 : index
    %c0_82 = arith.constant 0 : index
    %206 = vector.load %arg23[%c0_81, %c0_82] : memref<16x32xf32, #tpu.memory_space<vmem>>, vector<16x32xf32>
    tpu.vector_store %arg23[%c0_81, %c0_82], %205 {strides = array<i32>} : memref<16x32xf32, #tpu.memory_space<vmem>>, vector<16x32xf32>,
    %c1_i32 = arith.constant 1 : i32
    %207 = arith.cmpi eq, %arg1, %c1_i32 : i32
    %208 = arith.extui %207 : i1 to i32
    %c0_i32_83 = arith.constant 0 : i32
    %209 = arith.cmpi ne, %208, %c0_i32_83 : i32
    scf.if %209 {
      %210 = vector.extract_strided_slice %205 {offsets = [0, 0], sizes = [1, 32], strides = [1, 1]} : vector<16x32xf32> to vector<1x32xf32>
      %211 = vector.extract_strided_slice %205 {offsets = [8, 0], sizes = [1, 32], strides = [1, 1]} : vector<16x32xf32> to vector<1x32xf32>
      %212 = tpu.concatenate %210, %211 in 0 : vector<1x32xf32>, vector<1x32xf32> -> vector<2x32xf32>
      %213 = arith.truncf %212 : vector<2x32xf32> to vector<2x32xbf16>
      %c0_84 = arith.constant 0 : index
      %c0_85 = arith.constant 0 : index
      %214 = vector.load %arg18[%c0_84, %c0_85] : memref<32x32xbf16, #tpu.memory_space<vmem>>, vector<32x32xbf16>
      %cst_86 = arith.constant dense<0.000000e+00> : vector<2x32xf32>
      %215 = tpu.matmul %213, %214, %cst_86 {dimension_numbers = #tpu.dot_dimension_numbers<[1], [0], [0], [1], [0, 0, 1, 1], [], []>} : vector<2x32xbf16>, vector<32x32xbf16>, vector<2x32xf32> -> vector<2x32xf32>
      %c0_87 = arith.constant 0 : index
      %c0_88 = arith.constant 0 : index
      %216 = vector.load %arg19[%c0_87, %c0_88] : memref<1x32xf32, #tpu.memory_space<vmem>>, vector<1x32xf32>
      %217 = vector.broadcast %216 : vector<1x32xf32> to vector<2x32xf32>
      %218 = arith.addf %215, %217 : vector<2x32xf32>
      %219 = math.tanh %218 : vector<2x32xf32>
      %220 = arith.truncf %219 : vector<2x32xf32> to vector<2x32xbf16>
      %c0_89 = arith.constant 0 : index
      %c0_90 = arith.constant 0 : index
      %221 = vector.load %arg20[%c0_89, %c0_90] : memref<32x4xbf16, #tpu.memory_space<vmem>>, vector<32x4xbf16>
      %cst_91 = arith.constant dense<0.000000e+00> : vector<2x4xf32>
      %222 = tpu.matmul %220, %221, %cst_91 {dimension_numbers = #tpu.dot_dimension_numbers<[1], [0], [0], [1], [0, 0, 1, 1], [], []>} : vector<2x32xbf16>, vector<32x4xbf16>, vector<2x4xf32> -> vector<2x4xf32>
      %c0_92 = arith.constant 0 : index
      %c0_93 = arith.constant 0 : index
      %223 = vector.load %arg21[%c0_92, %c0_93] : memref<1x4xf32, #tpu.memory_space<vmem>>, vector<1x4xf32>
      %224 = vector.broadcast %223 : vector<1x4xf32> to vector<2x4xf32>
      %225 = arith.addf %222, %224 : vector<2x4xf32>
      %c0_94 = arith.constant 0 : index
      %c0_95 = arith.constant 0 : index
      %c0_96 = arith.constant 0 : index
      %226 = vector.load %arg22[%c0_94, %c0_95, %c0_96] : memref<1x2x4xf32, #tpu.memory_space<vmem>>, vector<1x2x4xf32>
      %227 = vector.shape_cast %226 : vector<1x2x4xf32> to vector<2x4xf32>
      %228 = vector.shape_cast %225 : vector<2x4xf32> to vector<1x2x4xf32>
      tpu.vector_store %arg22[%c0_94, %c0_95, %c0_96], %228 {strides = array<i32>} : memref<1x2x4xf32, #tpu.memory_space<vmem>>, vector<1x2x4xf32>,
    } else {
    }
    return
  }
  func.func @transform_0(%arg0: i32, %arg1: i32) -> (i32, i32) {
    %c0_i32 = arith.constant 0 : i32
    %c0_i32_0 = arith.constant 0 : i32
    return %arg0, %c0_i32 : i32, i32
  }
  func.func @transform_1(%arg0: i32, %arg1: i32) -> (i32, i32, i32) {
    %c0_i32 = arith.constant 0 : i32
    %c0_i32_0 = arith.constant 0 : i32
    %c0_i32_1 = arith.constant 0 : i32
    return %arg0, %c0_i32, %c0_i32_0 : i32, i32, i32
  }
  func.func @transform_2(%arg0: i32, %arg1: i32) -> (i32, i32) {
    %c0_i32 = arith.constant 0 : i32
    %c0_i32_0 = arith.constant 0 : i32
    %c0_i32_1 = arith.constant 0 : i32
    return %c0_i32, %c0_i32_0 : i32, i32
  }
  func.func @transform_3(%arg0: i32, %arg1: i32) -> (i32, i32) {
    %c0_i32 = arith.constant 0 : i32
    %c0_i32_0 = arith.constant 0 : i32
    %c0_i32_1 = arith.constant 0 : i32
    return %c0_i32, %c0_i32_0 : i32, i32
  }
  func.func @transform_4(%arg0: i32, %arg1: i32) -> (i32, i32, i32) {
    %c0_i32 = arith.constant 0 : i32
    %c0_i32_0 = arith.constant 0 : i32
    %c0_i32_1 = arith.constant 0 : i32
    return %arg1, %c0_i32, %c0_i32_0 : i32, i32, i32
  }
  func.func @transform_5(%arg0: i32, %arg1: i32) -> (i32, i32, i32) {
    %c0_i32 = arith.constant 0 : i32
    %c0_i32_0 = arith.constant 0 : i32
    %c0_i32_1 = arith.constant 0 : i32
    return %arg1, %c0_i32, %c0_i32_0 : i32, i32, i32
  }
  func.func @transform_6(%arg0: i32, %arg1: i32) -> (i32, i32, i32) {
    %c0_i32 = arith.constant 0 : i32
    %c0_i32_0 = arith.constant 0 : i32
    %c0_i32_1 = arith.constant 0 : i32
    return %arg1, %c0_i32, %c0_i32_0 : i32, i32, i32
  }
  func.func @transform_7(%arg0: i32, %arg1: i32) -> (i32, i32, i32) {
    %c0_i32 = arith.constant 0 : i32
    %c0_i32_0 = arith.constant 0 : i32
    %c0_i32_1 = arith.constant 0 : i32
    return %arg1, %c0_i32, %c0_i32_0 : i32, i32, i32
  }
  func.func @transform_8(%arg0: i32, %arg1: i32) -> (i32, i32, i32) {
    %c0_i32 = arith.constant 0 : i32
    %c0_i32_0 = arith.constant 0 : i32
    %c0_i32_1 = arith.constant 0 : i32
    return %arg1, %c0_i32, %c0_i32_0 : i32, i32, i32
  }
  func.func @transform_9(%arg0: i32, %arg1: i32) -> (i32, i32, i32) {
    %c0_i32 = arith.constant 0 : i32
    %c0_i32_0 = arith.constant 0 : i32
    %c0_i32_1 = arith.constant 0 : i32
    return %arg1, %c0_i32, %c0_i32_0 : i32, i32, i32
  }
  func.func @transform_10(%arg0: i32, %arg1: i32) -> (i32, i32, i32) {
    %c0_i32 = arith.constant 0 : i32
    %c0_i32_0 = arith.constant 0 : i32
    %c0_i32_1 = arith.constant 0 : i32
    return %arg1, %c0_i32, %c0_i32_0 : i32, i32, i32
  }
  func.func @transform_11(%arg0: i32, %arg1: i32) -> (i32, i32, i32) {
    %c0_i32 = arith.constant 0 : i32
    %c0_i32_0 = arith.constant 0 : i32
    %c0_i32_1 = arith.constant 0 : i32
    return %arg1, %c0_i32, %c0_i32_0 : i32, i32, i32
  }
  func.func @transform_12(%arg0: i32, %arg1: i32) -> (i32, i32, i32) {
    %c0_i32 = arith.constant 0 : i32
    %c0_i32_0 = arith.constant 0 : i32
    %c0_i32_1 = arith.constant 0 : i32
    return %arg1, %c0_i32, %c0_i32_0 : i32, i32, i32
  }
  func.func @transform_13(%arg0: i32, %arg1: i32) -> (i32, i32, i32) {
    %c0_i32 = arith.constant 0 : i32
    %c0_i32_0 = arith.constant 0 : i32
    %c0_i32_1 = arith.constant 0 : i32
    return %arg1, %c0_i32, %c0_i32_0 : i32, i32, i32
  }
  func.func @transform_14(%arg0: i32, %arg1: i32) -> (i32, i32, i32) {
    %c0_i32 = arith.constant 0 : i32
    %c0_i32_0 = arith.constant 0 : i32
    %c0_i32_1 = arith.constant 0 : i32
    return %arg1, %c0_i32, %c0_i32_0 : i32, i32, i32
  }
  func.func @transform_15(%arg0: i32, %arg1: i32) -> (i32, i32, i32) {
    %c0_i32 = arith.constant 0 : i32
    %c0_i32_0 = arith.constant 0 : i32
    %c0_i32_1 = arith.constant 0 : i32
    return %arg1, %c0_i32, %c0_i32_0 : i32, i32, i32
  }
  func.func @transform_16(%arg0: i32, %arg1: i32) -> (i32, i32) {
    %c0_i32 = arith.constant 0 : i32
    %c0_i32_0 = arith.constant 0 : i32
    %c0_i32_1 = arith.constant 0 : i32
    return %c0_i32, %c0_i32_0 : i32, i32
  }
  func.func @transform_17(%arg0: i32, %arg1: i32) -> (i32, i32) {
    %c0_i32 = arith.constant 0 : i32
    %c0_i32_0 = arith.constant 0 : i32
    %c0_i32_1 = arith.constant 0 : i32
    return %c0_i32, %c0_i32_0 : i32, i32
  }
  func.func @transform_18(%arg0: i32, %arg1: i32) -> (i32, i32) {
    %c0_i32 = arith.constant 0 : i32
    %c0_i32_0 = arith.constant 0 : i32
    %c0_i32_1 = arith.constant 0 : i32
    return %c0_i32, %c0_i32_0 : i32, i32
  }
  func.func @transform_19(%arg0: i32, %arg1: i32) -> (i32, i32) {
    %c0_i32 = arith.constant 0 : i32
    %c0_i32_0 = arith.constant 0 : i32
    %c0_i32_1 = arith.constant 0 : i32
    return %c0_i32, %c0_i32_0 : i32, i32
  }
  func.func @transform_20(%arg0: i32, %arg1: i32) -> (i32, i32, i32) {
    %c0_i32 = arith.constant 0 : i32
    %c0_i32_0 = arith.constant 0 : i32
    %c0_i32_1 = arith.constant 0 : i32
    return %arg0, %c0_i32, %c0_i32_0 : i32, i32, i32
  }
}

</mosaic_0001>

<bundles_post_ra>
// kernel: text_model_forward.1
= control target key start
LH: loop header
LB: loop body
LE: loop exit
PB: predicated region body
PF: predicated region fallthrough
CT: control target
= control target key end

     0   :  { %s3062_s0 = inlined_call_operand.vmem [shape: f32[16,32], index: 0, kind: input, shape index: {}]   ;;  %s3063_s1 = inlined_call_operand.vmem [shape: f32[2,1,8], index: 1, kind: input, shape index: {}]   ;;  %s3064_s2 = inlined_call_operand.vmem [shape: f32[1,32], index: 2, kind: input, shape index: {}]   ;;  %s3065_s3 = inlined_call_operand.vmem [shape: f32[1,32], index: 3, kind: input, shape index: {}]   ;;  %s3066_s4 = inlined_call_operand.vmem [shape: bf16[2,32,96], index: 4, kind: input, shape index: {}]   ;;  %s3067_s5 = inlined_call_operand.vmem [shape: f32[2,1,96], index: 5, kind: input, shape index: {}]   ;;  %s3068_s6 = inlined_call_operand.vmem [shape: bf16[2,32,32], index: 6, kind: input, shape index: {}]   ;;  %s3069_s7 = inlined_call_operand.vmem [shape: f32[2,1,32], index: 7, kind: input, shape index: {}]   ;;  %s3070_s8 = inlined_call_operand.vmem [shape: f32[2,1,32], index: 8, kind: input, shape index: {}]   ;;  %s3071_s9 = inlined_call_operand.vmem [shape: f32[2,1,32], index: 9, kind: input, shape index: {}]   ;;  %s3072_s10 = inlined_call_operand.vmem [shape: bf16[2,32,64], index: 10, kind: input, shape index: {}]   ;;  %s3073_s11 = inlined_call_operand.vmem [shape: f32[2,1,64], index: 11, kind: input, shape index: {}]   ;;  %s3074_s12 = inlined_call_operand.vmem [shape: bf16[2,64,32], index: 12, kind: input, shape index: {}]   ;;  %s3075_s13 = inlined_call_operand.vmem [shape: f32[2,1,32], index: 13, kind: input, shape index: {}]   ;;  %s3076_s14 = inlined_call_operand.vmem [shape: f32[2,1,32], index: 14, kind: input, shape index: {}]   ;;  %s3077_s15 = inlined_call_operand.vmem [shape: f32[2,1,32], index: 15, kind: input, shape index: {}]   ;;  %s3078_s16 = inlined_call_operand.vmem [shape: bf16[32,32], index: 16, kind: input, shape index: {}]   ;;  %s3079_s17 = inlined_call_operand.vmem [shape: f32[1,32], index: 17, kind: input, shape index: {}]   ;;  %s3080_s18 = inlined_call_operand.vmem [shape: bf16[32,4], index: 18, kind: input, shape index: {}]   ;;  %s3081_s19 = inlined_call_operand.vmem [shape: f32[1,4], index: 19, kind: input, shape index: {}]   ;;  %s3082_s20 = inlined_call_operand.hbm [shape: f32[1,2,4], index: 20, kind: output, shape index: {}]  }
   0x1   :  { %3090 = sst [smem:[#allocation9_spill]] %s3062_s0 }
   0x2   :  { %3091 = sst [smem:[#allocation10_spill]] %s3063_s1 }
   0x3   :  { %3092 = sst [smem:[#allocation11_spill]] %s3064_s2 }
   0x4   :  { %3093 = sst [smem:[#allocation12_spill]] %s3065_s3 }
   0x5   :  { %3094 = sst [smem:[#allocation13_spill]] %s3066_s4 }
   0x6   :  { %3095 = sst [smem:[#allocation14_spill]] %s3068_s6 }
   0x7   :  { %3096 = sst [smem:[#allocation15_spill]] %s3078_s16 }
   0x8   :  { %3097 = sst [smem:[#allocation16_spill]] %s3079_s17 }
   0x9   :  { %3098 = sst [smem:[#allocation17_spill]] %s3080_s18 }
   0xa   :  { %3099 = sst [smem:[#allocation18_spill]] %s3081_s19 }
   0xb   :  { %3100 = sst [smem:[#allocation19_spill]] %s3082_s20 }
   0xc   :  { %25 = vsyncpa [#allocation4], 0  ;;  %s2721_s1 = smov 0   ;;  %s2723_s22 = smov 0  }
   0xd   :  { %s2725_s23 = smov 0  }
   0xe LB: > { %3101 = sst [smem:[#allocation6_spill]] %s2600_s22  ;;  %s40_s2 = sadd.s32 1, %s2600_s22  ;;  %s2604_s23 = sphi %s2725_s23, %s31_s23   ;;  %s2600_s22 = sphi %s2723_s22, %s3125_s22   ;;  %s2596_s1 = sphi %s2721_s1, %s3124_s1  }
   0xf   : > { %3102 = sst [smem:[#allocation7_spill]] %s2604_s23  ;;  %p41_p0 = scmp.ge.s32.totalorder %s40_s2, 2 }
  0x10   : > { %p2242_p1 = scmp.ge.s32.totalorder %s2604_s23, 1  ;;  %p690_p2 = scmp.lt.s32.totalorder %s2604_s23, 3 }
  0x11   : > { %s3127_s2 = smov (%p41_p0, %s40_s2), 0 }
  0x12   : > { %3103 = sst [smem:[#allocation8_spill]] %s3127_s2  ;;  %p691_p3 = pnand %p2242_p1, %p690_p2 }
  0x13   : > { %p802_p4 = scmp.lt.s32.totalorder (!%p691_p3), %s2596_s1, 1  ;;  %s3104_s30 = sld [smem:[#allocation13_spill]] (!%p691_p3) }
  0x14   : > { %694 = sbr.rel (%p691_p3) target bundleno = 4002 (0xfa2), region = 100  ;;  %s3105_s6 = sld [smem:[#allocation14_spill]] (!%p691_p3) }
  0x15   : > { %p2251_p5 = scmp.ne.s32.totalorder (!%p691_p3), %s2596_s1, 0 }
  0x1b   : > { %s2744_s25 = scalar_select %p802_p4, %s2596_s1, 1 }
  0x1c   : > { %850 = sbr.rel (%p2251_p5) target bundleno = 353 (0x161), region = 104  ;;  %s3106_s20 = sld [smem:[#allocation9_spill]] (!%p2251_p5)  ;;  %vm855_vm0 = vcmask (!%p2251_p5), 261120  }
  0x1d   : > { %s2303_s3 = sshll.u32 %s2744_s25, 4  ;;  %s2306_s16 = sshll.u32 %s2744_s25, 5 }
  0x1e   : > { %s2754_s0 = scalar_lea.vmem %s3104_s30, %s2303_s3  ;;  %s2759_s2 = scalar_lea.vmem %s3105_s6, %s2303_s3 }
  0x1f   : > { %s2776_s30 = scalar_lea.vmem %s3072_s10, %s2303_s3  ;;  %s831_s6 = scalar_lea.vmem %s3073_s11, %s2744_s25 }
  0x20   : > { %s2786_s23 = scalar_lea.vmem %s3074_s12, %s2306_s16  ;;  %s839_s26 = scalar_lea.vmem %s3075_s13, %s2744_s25 }
  0x21   : > { %s842_s4 = scalar_lea.vmem %s3076_s14, %s2744_s25  ;;  %s845_s18 = scalar_lea.vmem %s3077_s15, %s2744_s25 }
  0x22   : > { %v851_v0 = vld [vmem:[%s3106_s20] sm:$0xff] (!%p2251_p5)  ;;  %v852_v1 = vld [vmem:[%s3106_s20 + $0x8] sm:$0xff] (!%p2251_p5)  ;;  %s3107_s19 = sld [smem:[#allocation11_spill]] (!%p2251_p5)  ;;  %s3108_s29 = sld [smem:[#allocation12_spill]] (!%p2251_p5) }
  0x23   : > { %v856_v2 = vsel %vm855_vm0, %v851_v0, 0.0  ;;  %v859_v3 = vsel %vm855_vm0, %v852_v1, 0.0 }
  0x24   : > { %857 = vadd.xlane.f32.xlu0 %v856_v2 }
  0x28   : > { %860 = vadd.xlane.f32.xlu0 %v859_v3  ;;  %v2252_v21 = vld [vmem:[%s3107_s19] ss:$0 sm:$0xff] }
  0x29   : > { %v2253_v23 = vld [vmem:[%s3108_s29] ss:$0 sm:$0xff] }
  0xb1   : > { %v858_v4 = vpop.xlane.xlu0 %857 }
  0xb2   : > { %v863_v5 = vmul.f32 0.03125, %v858_v4 }
  0xb4   : > { %v865_v6 = vsub.f32 %v851_v0, %v863_v5 }
  0xb5   : > { %v861_v7 = vpop.xlane.xlu0 %860 }
  0xb6   : > { %v864_v8 = vmul.f32 0.03125, %v861_v7  ;;  %v867_v9 = vmul.f32 %v865_v6, %v865_v6 }
  0xb8   : > { %v866_v10 = vsub.f32 %v852_v1, %v864_v8  ;;  %v869_v11 = vsel %vm855_vm0, %v867_v9, 0.0 }
  0xb9   : > { %870 = vadd.xlane.f32.xlu1 %v869_v11 }
  0xba   : > { %v868_v12 = vmul.f32 %v866_v10, %v866_v10 }
  0xbc   : > { %v872_v13 = vsel %vm855_vm0, %v868_v12, 0.0 }
  0xbd   : > { %873 = vadd.xlane.f32.xlu1 %v872_v13 }
 0x146   : > { %v871_v14 = vpop.xlane.xlu1 %870 }
 0x147   : > { %v875_v15 = vmul.f32 0.03125, %v871_v14 }
 0x149   : > { %v877_v16 = vadd.f32 1e-12, %v875_v15 }
 0x14a   : > { %v874_v17 = vpop.xlane.xlu1 %873 }
 0x14b   : > { %2504 = vrsqrt.f32 %v877_v16  ;;  %v876_v18 = vmul.f32 0.03125, %v874_v17 }
 0x14d   : > { %v878_v19 = vadd.f32 1e-12, %v876_v18 }
 0x14f   : > { %2506 = vrsqrt.f32 %v878_v19 }
 0x155   : > { %v2505_v20 = vpop.eup %2504 }
 0x156   : > { %v881_v22 = vmul.f32 %v2505_v20, %v865_v6 }
 0x158   : > { %v889_v24 = vmul.f32 %v2252_v21, %v881_v22 }
 0x159   : > { %v2507_v25 = vpop.eup %2506 }
 0x15a   : > { %v897_v26 = vadd.f32 %v2253_v23, %v889_v24  ;;  %v882_v27 = vmul.f32 %v2507_v25, %v866_v10 }
 0x15c   : > { %899 = vst.msk [vmem:[#allocation2] sm:$0xff] %vm855_vm0, %v897_v26  ;;  %v890_v28 = vmul.f32 %v2252_v21, %v882_v27 }
 0x15e   : > { %v898_v29 = vadd.f32 %v2253_v23, %v890_v28 }
 0x160   : > { %900 = vst.msk [vmem:[#allocation2 + $0x8] sm:$0xff] %vm855_vm0, %v898_v29 }
 0x161 PF: > { %v2508_v30 = vld [vmem:[%s2754_s0] sm:$0xff]   ;;  %v2606_v31 = vmov 0.0   ;;  %v2509_v32 = vld [vmem:[%s2754_s0 + $0x8] sm:$0xff]   ;;  %vm2607_vm1 = vmmov 0   ;;  %vm927_vm2 = vcmask 261120   ;;  %s3109_s21 = scalar_lea.vmem %s3067_s5, %s2744_s25  ;;  %s2608_s16 = smov 112  }
 0x162   : > { %2348 = vmatprep.subr.bf16.mxu1 %v2606_v31  ;;  %2362 = vmatprep.subr.bf16.mxu0 %v2606_v31  ;;  %v2254_v36 = vld [vmem:[%s3109_s21] ss:$0 sm:$0xff]  ;;  %s2609_s22 = smov 96   ;;  %s2610_s28 = smov 80   ;;  %vm987_vm3 = vcmask 130048   ;;  %vm1034_vm4 = vcmask 64512  }
 0x163   : > { %2349 = vmatpush3.bf16.msra.mxu1 %v2508_v30  ;;  %2352 = vmatprep.mubr.msk.bf16.mxu1 %vm2607_vm1, %v2606_v31  ;;  %v2825_v33 = vld [vmem:[#allocation2] sm:$0xff]  ;;  %s3110_s27 = sld [smem:[#allocation10_spill]]  ;;  %s2611_s3 = smov 64   ;;  %vm1052_vm5 = vcmask 1043456   ;;  %v2511_v22 = vld [vmem:[%s2759_s2 + $0x8] sm:$0xff]   ;;  %vm1804_vm6 = vcmask 523264  }
 0x164   : > { %2350 = vmatprep.subr.bf16.mxu1 %v2606_v31  ;;  %2364 = vmatprep.mubr.msk.bf16.mxu0 %vm2607_vm1, %v2606_v31  ;;  %s2612_s29 = smov 48   ;;  %v2884_v21 = vld [vmem:[%s2759_s2] sm:$0xff]   ;;  %p2290_p6 = scmp.ne.s32.totalorder %s2596_s1, 1 }
 0x165   : > { %vm2614_vm7 = vmmov (!%p2290_p6), 0   ;;  %vm1904_vm8 = vcmask (!%p2290_p6), 1040384   ;;  %s3116_s17 = sld [smem:[#allocation17_spill]] (!%p2290_p6)  ;;  %s3118_s0 = sld [smem:[#allocation18_spill]] (!%p2290_p6)  ;;  %vm2041_vm9 = vcmask (!%p2290_p6), 25600  }
 0x167   : > { %v2827_v34 = vld [vmem:[#allocation2 + $0x8] sm:$0xff]  ;;  %2351 = vmatpush3.bf16.msra.mxu1 %v2509_v32 }
 0x168   : > { %v903_v35 = vpack.c.bf16 %v2827_v34, %v2825_v33  ;;  %2356 = vmatprep.subr.bf16.mxu1 %v2606_v31 }
 0x169   : > { %v2258_v49 = vld [vmem:[%s3110_s27] ss:$0 sm:$0xff] }
 0x16a   : > { %2353 = vmatmul.mubr.msk.bf16.vlgmr.msra.gmra.mrb[0].mxu1 %vm927_vm2, %v903_v35 }
 0x16b   : > { %2358 = vmatprep.mubr.msk.bf16.mxu1 %vm2607_vm1, %v2606_v31 }
 0x23d   : > { %v965_v37 = vpop.f32.mrb[0].mxu1 }
 0x23e   : > { %v966_v38 = vadd.f32 %v2254_v36, %v965_v37  ;;  %v2354_v39 = vpop.f32.mrb[1].mxu1 }
 0x23f   : > { %v968_v40 = vpop.f32.mrb[2].mxu1 }
 0x240   : > { %v977_v41 = vpack.c.bf16 %v966_v38, %v966_v38  ;;  %v969_v42 = vadd.f32 %v2254_v36, %v968_v40  ;;  %v2355_v43 = vpop.f32.mrb[3].mxu1 }
 0x242   : > { %1097 = vrot.lane.b32.xlu1 %v977_v41, %s2608_s16  ;;  %985 = vrot.lane.b32.xlu0 %v977_v41, %s2609_s22  ;;  %v2864_v8 = vpack.c.bf16 %v969_v42, %v969_v42 }
 0x246   : > { %1099 = vrot.lane.b32.xlu0 %v977_v41, %s2610_s28 }
 0x2b4   : > { %v986_v44 = vpop.permute.xlu0 %985  ;;  %v1098_v48 = vpop.permute.xlu1 %1097 }
 0x2b5   : > { %v992_v45 = vsel %vm987_vm3, %v986_v44, 0 }
 0x2b6   : > { %2357 = vmatpush3.bf16.xpose.msra.mxu1 %v992_v45 }
 0x2b7   : > { %2368 = vmatprep.subr.bf16.mxu1 %v2606_v31 }
 0x2b8   : > { %v1100_v46 = vpop.permute.xlu0 %1099 }
 0x2b9   : > { %v1105_v47 = vsel %vm987_vm3, %v1100_v46, 0 }
 0x2bd   : > { %2359 = vmatmul.mubr.msk.bf16.vlgmr.msra.gmra.mrb[4].mxu1 %vm987_vm3, %v977_v41 }
 0x2be   : > { %2369 = vmatpush3.bf16.xpose.msra.mxu1 %v1105_v47  ;;  %2370 = vmatprep.mubr.msk.bf16.mxu1 %vm2607_vm1, %v2606_v31 }
 0x2bf   : > { %2380 = vmatprep.subr.bf16.mxu1 %v2606_v31 }
 0x2c5   : > { %2371 = vmatmul.mubr.msk.bf16.vlgmr.msra.gmra.mrb[8].mxu1 %vm987_vm3, %v1098_v48 }
 0x2c6   : > { %2382 = vmatprep.mubr.msk.bf16.mxu1 %vm2607_vm1, %v2606_v31  ;;  %2381 = vmatpush3.bf16.msra.mxu1 %v2511_v22 }
 0x2c7   : > { %2392 = vmatprep.subr.bf16.mxu1 %v2606_v31 }
 0x390   : > { %v1028_v50 = vpop.f32.mrb[4].mxu1 }
 0x391   : > { %v1029_v51 = vadd.f32 %v2258_v49, %v1028_v50  ;;  %v2360_v52 = vpop.f32.mrb[5].mxu1  ;;  %v2268_v50 = vld [vmem:[%s3110_s27 + $0x1] ss:$0 sm:$0xff] }
 0x392   : > { %v1031_v53 = vpop.f32.mrb[6].mxu1 }
 0x393   : > { %v2361_v54 = vpop.f32.mrb[7].mxu1  ;;  %v1035_v55 = vsel %vm1034_vm4, %v1029_v51, -inf }
 0x394   : > { %1036 = vmax.xlane.f32.xlu1 %v1035_v55 }
 0x398   : > { %v1141_v56 = vpop.f32.mrb[8].mxu1 }
 0x399   : > { %v1142_v57 = vadd.f32 %v2258_v49, %v1141_v56  ;;  %v2372_v58 = vpop.f32.mrb[9].mxu1 }
 0x39a   : > { %v1144_v59 = vpop.f32.mrb[10].mxu1 }
 0x39b   : > { %v2373_v60 = vpop.f32.mrb[11].mxu1  ;;  %v1147_v61 = vsel %vm1034_vm4, %v1142_v57, -inf }
 0x39c   : > { %1148 = vmax.xlane.f32.xlu0 %v1147_v61 }
 0x421   : > { %v1037_v62 = vpop.xlane.xlu1 %1036 }
 0x422   : > { %v1038_v63 = vsub.f32 %v1029_v51, %v1037_v62 }
 0x424   : > { %v1039_v0 = vmul.f32 1.442695, %v1038_v63 }
 0x426   : > { %2518 = vpow2.f32 %v1039_v0 }
 0x429   : > { %v1149_v1 = vpop.xlane.xlu0 %1148 }
 0x42a   : > { %v1150_v2 = vsub.f32 %v1142_v57, %v1149_v1 }
 0x42c   : > { %v1151_v3 = vmul.f32 1.442695, %v1150_v2 }
 0x42e   : > { %2520 = vpow2.f32 %v1151_v3 }
 0x430   : > { %v2519_v4 = vpop.eup %2518 }
 0x431   : > { %v1041_v5 = vsel %vm1034_vm4, %v2519_v4, 0.0 }
 0x432   : > { %1042 = vadd.xlane.f32.xlu0 %v1041_v5 }
 0x438   : > { %v2521_v6 = vpop.eup %2520 }
 0x439   : > { %v1153_v7 = vsel %vm1034_vm4, %v2521_v6, 0.0 }
 0x43a   : > { %1154 = vadd.xlane.f32.xlu1 %v1153_v7 }
 0x448   : > { %1047 = vrot.lane.b32.xlu0 %v977_v41, %s2611_s3 }
 0x44b   : > { %1159 = vrot.lane.b32.xlu1 %v977_v41, %s2612_s29 }
 0x44c   : > { %1427 = vrot.lane.b32.xlu0 %v2864_v8, %s2610_s28 }
 0x44f   : > { %1316 = vrot.lane.b32.xlu1 %v2864_v8, %s2609_s22  ;;  %s3114_s22 = sld [smem:[#allocation15_spill]] (!%p2290_p6) }
 0x453   : > { %1425 = vrot.lane.b32.xlu1 %v2864_v8, %s2608_s16  ;;  %s3111_s16 = scalar_lea.vmem %s3069_s7, %s2744_s25 }
 0x454   : > { %v2920_v63 = vld [vmem:[%s3111_s16] ss:$0 sm:$0xff] }
 0x455   : > { %s3115_s28 = smov (!%p2290_p6), %s3114_s22 }
 0x4bf   : > { %v1043_v9 = vpop.xlane.xlu0 %1042 }
 0x4c0   : > { %2522 = vrcp.f32 %v1043_v9 }
 0x4c3   : > { %v1048_v10 = vpop.permute.xlu0 %1047 }
 0x4c4   : > { %v1054_v11 = vsel %vm1052_vm5, %v1048_v10, 0 }
 0x4c5   : > { %2363 = vmatpush3.bf16.msra.mxu0 %v1054_v11 }
 0x4c6   : > { %2374 = vmatprep.subr.bf16.mxu0 %v2606_v31 }
 0x4c7   : > { %v1155_v12 = vpop.xlane.xlu1 %1154  ;;  %v1428_v38 = vpop.permute.xlu0 %1427 }
 0x4c8   : > { %2524 = vrcp.f32 %v1155_v12  ;;  %v1433_v39 = vsel %vm987_vm3, %v1428_v38, 0 }
 0x4ca   : > { %v2523_v13 = vpop.eup %2522 }
 0x4cb   : > { %v1045_v14 = vmul.f32 %v2523_v13, %v2519_v4  ;;  %v1160_v15 = vpop.permute.xlu1 %1159 }
 0x4cc   : > { %v1165_v17 = vsel %vm1052_vm5, %v1160_v15, 0 }
 0x4cd   : > { %v1046_v16 = vpack.c.bf16 %v1045_v14, %v1045_v14 }
 0x4cf   : > { %2365 = vmatmul.mubr.msk.bf16.vlgmr.msra.gmra.mrb[0].mxu0 %vm1034_vm4, %v1046_v16  ;;  %v1317_v28 = vpop.permute.xlu1 %1316 }
 0x4d0   : > { %2375 = vmatpush3.bf16.msra.mxu0 %v1165_v17  ;;  %2376 = vmatprep.mubr.msk.bf16.mxu0 %vm2607_vm1, %v2606_v31  ;;  %v1322_v36 = vsel %vm987_vm3, %v1317_v28, 0 }
 0x4d1   : > { %2386 = vmatprep.subr.bf16.mxu0 %v2606_v31 }
 0x4d2   : > { %v2525_v18 = vpop.eup %2524 }
 0x4d3   : > { %v1157_v19 = vmul.f32 %v2525_v18, %v2521_v6  ;;  %v1426_v40 = vpop.permute.xlu1 %1425 }
 0x4d5   : > { %v1158_v20 = vpack.c.bf16 %v1157_v19, %v1157_v19 }
 0x4d7   : > { %2377 = vmatmul.mubr.msk.bf16.vlgmr.msra.gmra.mrb[4].mxu0 %vm1034_vm4, %v1158_v20 }
 0x4d8   : > { %2388 = vmatprep.mubr.msk.bf16.mxu0 %vm2607_vm1, %v2606_v31  ;;  %2387 = vmatpush3.bf16.msra.mxu0 %v2884_v21 }
 0x4d9   : > { %2398 = vmatprep.subr.bf16.mxu0 %v2606_v31 }
 0x5a2   : > { %v1090_v23 = vpop.f32.mrb[0].mxu0 }
 0x5a3   : > { %v1096_v24 = vpack.c.bf16 %v1090_v23, %v1090_v23  ;;  %v2366_v25 = vpop.f32.mrb[1].mxu0 }
 0x5a4   : > { %v1093_v26 = vpop.f32.mrb[2].mxu0 }
 0x5a5   : > { %v2367_v27 = vpop.f32.mrb[3].mxu0  ;;  %2389 = vmatmul.mubr.msk.bf16.vlgmr.msra.gmra.mrb[8].mxu0 %vm987_vm3, %v1096_v24 }
 0x5a6   : > { %2400 = vmatprep.mubr.msk.bf16.mxu0 %vm2607_vm1, %v2606_v31 }
 0x5aa   : > { %v1201_v29 = vpop.f32.mrb[4].mxu0 }
 0x5ab   : > { %v1207_v30 = vpack.c.bf16 %v1201_v29, %v1201_v29  ;;  %v2378_v32 = vpop.f32.mrb[5].mxu0 }
 0x5ac   : > { %v1204_v35 = vpop.f32.mrb[6].mxu0 }
 0x5ad   : > { %v2379_v37 = vpop.f32.mrb[7].mxu0  ;;  %2383 = vmatmul.mubr.msk.bf16.vlgmr.msra.gmra.mrb[12].mxu1 %vm987_vm3, %v1207_v30 }
 0x5ae   : > { %2393 = vmatpush3.bf16.xpose.msra.mxu1 %v1322_v36  ;;  %2394 = vmatprep.mubr.msk.bf16.mxu1 %vm2607_vm1, %v2606_v31 }
 0x5af   : > { %2404 = vmatprep.subr.bf16.mxu1 %v2606_v31 }
 0x5b5   : > { %2395 = vmatmul.mubr.msk.bf16.vlgmr.msra.gmra.mrb[16].mxu1 %vm987_vm3, %v2864_v8 }
 0x5b6   : > { %2405 = vmatpush3.bf16.xpose.msra.mxu1 %v1433_v39  ;;  %2406 = vmatprep.mubr.msk.bf16.mxu1 %vm2607_vm1, %v2606_v31 }
 0x5b7   : > { %2416 = vmatprep.subr.bf16.mxu1 %v2606_v31 }
 0x5bd   : > { %2407 = vmatmul.mubr.msk.bf16.vlgmr.msra.gmra.mrb[20].mxu1 %vm987_vm3, %v1426_v40 }
 0x5be   : > { %2417 = vmatpush3.bf16.msra.mxu1 %v2511_v22  ;;  %2418 = vmatprep.mubr.msk.bf16.mxu1 %vm2607_vm1, %v2606_v31 }
 0x5bf   : > { %2428 = vmatprep.subr.bf16.mxu1 %v2606_v31 }
 0x678   : > { %v1300_v41 = vpop.f32.mrb[8].mxu0 }
 0x679   : > { %v2390_v42 = vpop.f32.mrb[9].mxu0 }
 0x67a   : > { %v1303_v43 = vpop.f32.mrb[10].mxu0 }
 0x67b   : > { %v2391_v44 = vpop.f32.mrb[11].mxu0 }
 0x680   : > { %v1251_v45 = vpop.f32.mrb[12].mxu1 }
 0x681   : > { %v1301_v46 = vadd.f32 %v1300_v41, %v1251_v45  ;;  %v2384_v47 = vpop.f32.mrb[13].mxu1 }
 0x682   : > { %v1254_v48 = vpop.f32.mrb[14].mxu1 }
 0x683   : > { %v2385_v49 = vpop.f32.mrb[15].mxu1  ;;  %v1629_v0 = vadd.f32 %v2920_v63, %v1301_v46 }
 0x685   : > { %v1631_v1 = vadd.f32 %v1629_v0, %v2825_v33 }
 0x687   : > { %v1635_v2 = vsel %vm927_vm2, %v1631_v1, 0.0 }
 0x688   : > { %v1358_v51 = vpop.f32.mrb[16].mxu1 }
 0x689   : > { %v1359_v52 = vadd.f32 %v2268_v50, %v1358_v51  ;;  %v2396_v53 = vpop.f32.mrb[17].mxu1 }
 0x68a   : > { %v1361_v54 = vpop.f32.mrb[18].mxu1 }
 0x68b   : > { %v2397_v55 = vpop.f32.mrb[19].mxu1  ;;  %v1364_v56 = vsel %vm1034_vm4, %v1359_v52, -inf }
 0x68c   : > { %1365 = vmax.xlane.f32.xlu0 %v1364_v56 }
 0x690   : > { %v1469_v57 = vpop.f32.mrb[20].mxu1 }
 0x691   : > { %v1470_v58 = vadd.f32 %v2268_v50, %v1469_v57  ;;  %v2408_v59 = vpop.f32.mrb[21].mxu1 }
 0x692   : > { %v1472_v60 = vpop.f32.mrb[22].mxu1  ;;  %v2512_v59 = vld [vmem:[%s2776_s30] sm:$0xff]  }
 0x693   : > { %v2409_v61 = vpop.f32.mrb[23].mxu1  ;;  %v1475_v62 = vsel %vm1034_vm4, %v1470_v58, -inf  ;;  %v2513_v60 = vld [vmem:[%s2776_s30 + $0x8] sm:$0xff]   ;;  %s3112_s30 = scalar_lea.vmem %s3070_s8, %s2744_s25 }
 0x694   : > { %1476 = vmax.xlane.f32.xlu1 %v1475_v62 }
 0x6a5   : > { %1376 = vrot.lane.b32.xlu1 %v2864_v8, %s2611_s3  ;;  %s3113_s3 = scalar_lea.vmem %s3071_s9, %s2744_s25 }
 0x6c9   : > { %1636 = vadd.xlane.f32.xlu1 %v1635_v2 }
 0x719   : > { %v1366_v3 = vpop.xlane.xlu0 %1365 }
 0x71a   : > { %v1367_v4 = vsub.f32 %v1359_v52, %v1366_v3 }
 0x71c   : > { %v1368_v5 = vmul.f32 1.442695, %v1367_v4  ;;  %v2276_v4 = vld [vmem:[%s3112_s30] ss:$0 sm:$0xff] }
 0x71e   : > { %2526 = vpow2.f32 %v1368_v5 }
 0x721   : > { %v1477_v6 = vpop.xlane.xlu1 %1476 }
 0x722   : > { %v1478_v7 = vsub.f32 %v1470_v58, %v1477_v6 }
 0x724   : > { %v1479_v9 = vmul.f32 1.442695, %v1478_v7 }
 0x725   : > { %v1377_v10 = vpop.permute.xlu1 %1376 }
 0x726   : > { %2528 = vpow2.f32 %v1479_v9  ;;  %v1382_v11 = vsel %vm1052_vm5, %v1377_v10, 0  ;;  %v2277_v9 = vld [vmem:[%s3113_s3] ss:$0 sm:$0xff] }
 0x727   : > { %2399 = vmatpush3.bf16.msra.mxu0 %v1382_v11 }
 0x728   : > { %v2527_v12 = vpop.eup %2526  ;;  %2410 = vmatprep.subr.bf16.mxu0 %v2606_v31 }
 0x729   : > { %v1370_v33 = vsel %vm1034_vm4, %v2527_v12, 0.0 }
 0x72a   : > { %1371 = vadd.xlane.f32.xlu0 %v1370_v33 }
 0x730   : > { %v2529_v13 = vpop.eup %2528 }
 0x731   : > { %v1481_v14 = vsel %vm1034_vm4, %v2529_v13, 0.0 }
 0x732   : > { %1482 = vadd.xlane.f32.xlu0 %v1481_v14  ;;  %v2515_v14 = vld [vmem:[%s2786_s23 + $0x8] sm:$0xff]  }
 0x748   : > { %1487 = vrot.lane.b32.xlu0 %v2864_v8, %s2612_s29 }
 0x756   : > { %v1637_v15 = vpop.xlane.xlu1 %1636 }
 0x757   : > { %v1642_v16 = vmul.f32 0.03125, %v1637_v15  ;;  %v2516_v15 = vld [vmem:[%s2786_s23 + $0x10] sm:$0xff]  }
 0x759   : > { %v2931_v17 = vsub.f32 %v1631_v1, %v1642_v16  ;;  %v2517_v16 = vld [vmem:[%s2786_s23 + $0x18] sm:$0xff]  }
 0x75b   : > { %v1646_v18 = vmul.f32 %v2931_v17, %v2931_v17 }
 0x75d   : > { %v1648_v19 = vsel %vm927_vm2, %v1646_v18, 0.0 }
 0x75e   : > { %1649 = vadd.xlane.f32.xlu1 %v1648_v19 }
 0x7b7   : > { %v1372_v20 = vpop.xlane.xlu0 %1371 }
 0x7b8   : > { %2530 = vrcp.f32 %v1372_v20 }
 0x7bf   : > { %v1483_v22 = vpop.xlane.xlu0 %1482 }
 0x7c0   : > { %2532 = vrcp.f32 %v1483_v22 }
 0x7c2   : > { %v2531_v23 = vpop.eup %2530 }
 0x7c3   : > { %v1374_v24 = vmul.f32 %v2531_v23, %v2527_v12  ;;  %v1488_v25 = vpop.permute.xlu0 %1487 }
 0x7c4   : > { %v1493_v8 = vsel %vm1052_vm5, %v1488_v25, 0 }
 0x7c5   : > { %v1375_v26 = vpack.c.bf16 %v1374_v24, %v1374_v24 }
 0x7c7   : > { %2401 = vmatmul.mubr.msk.bf16.vlgmr.msra.gmra.mrb[12].mxu0 %vm1034_vm4, %v1375_v26 }
 0x7c8   : > { %2411 = vmatpush3.bf16.msra.mxu0 %v1493_v8  ;;  %2412 = vmatprep.mubr.msk.bf16.mxu0 %vm2607_vm1, %v2606_v31 }
 0x7c9   : > { %2422 = vmatprep.subr.bf16.mxu0 %v2606_v31 }
 0x7ca   : > { %v2533_v27 = vpop.eup %2532 }
 0x7cb   : > { %v1485_v28 = vmul.f32 %v2533_v27, %v2529_v13  ;;  %v2514_v13 = vld [vmem:[%s2786_s23] sm:$0xff]  }
 0x7cd   : > { %v1486_v29 = vpack.c.bf16 %v1485_v28, %v1485_v28 }
 0x7cf   : > { %2413 = vmatmul.mubr.msk.bf16.vlgmr.msra.gmra.mrb[16].mxu0 %vm1034_vm4, %v1486_v29 }
 0x7d0   : > { %2423 = vmatpush3.bf16.msra.mxu0 %v2884_v21  ;;  %2424 = vmatprep.mubr.msk.bf16.mxu0 %vm2607_vm1, %v2606_v31 }
 0x7d1   : > { %2436 = vmatprep.subr.bf16.mxu0 %v2606_v31 }
 0x7eb   : > { %v1650_v61 = vpop.xlane.xlu1 %1649 }
 0x89a   : > { %v1418_v30 = vpop.f32.mrb[12].mxu0 }
 0x89b   : > { %v1424_v32 = vpack.c.bf16 %v1418_v30, %v1418_v30  ;;  %v2402_v35 = vpop.f32.mrb[13].mxu0 }
 0x89c   : > { %v1421_v36 = vpop.f32.mrb[14].mxu0 }
 0x89d   : > { %v2403_v37 = vpop.f32.mrb[15].mxu0  ;;  %2425 = vmatmul.mubr.msk.bf16.vlgmr.msra.gmra.mrb[20].mxu0 %vm987_vm3, %v1424_v32 }
 0x89e   : > { %2444 = vmatprep.mubr.msk.bf16.mxu0 %vm2607_vm1, %v2606_v31  ;;  %2437 = vmatpush3.bf16.msra.mxu0 %v2514_v13 }
 0x89f   : > { %2438 = vmatprep.subr.bf16.mxu0 %v2606_v31 }
 0x8a2   : > { %v1529_v38 = vpop.f32.mrb[16].mxu0  ;;  %2439 = vmatpush3.bf16.msra.mxu0 %v2515_v14 }
 0x8a3   : > { %v1535_v39 = vpack.c.bf16 %v1529_v38, %v1529_v38  ;;  %v2414_v40 = vpop.f32.mrb[17].mxu0  ;;  %2440 = vmatprep.subr.bf16.mxu0 %v2606_v31 }
 0x8a4   : > { %v1532_v41 = vpop.f32.mrb[18].mxu0 }
 0x8a5   : > { %v2415_v21 = vpop.f32.mrb[19].mxu0  ;;  %2419 = vmatmul.mubr.msk.bf16.vlgmr.msra.gmra.mrb[24].mxu1 %vm987_vm3, %v1535_v39 }
 0x8a6   : > { %2432 = vmatprep.mubr.msk.bf16.mxu1 %vm2607_vm1, %v2606_v31  ;;  %2429 = vmatpush3.bf16.msra.mxu1 %v2512_v59 }
 0x8a7   : > { %2430 = vmatprep.subr.bf16.mxu1 %v2606_v31  ;;  %2441 = vmatpush3.bf16.msra.mxu0 %v2516_v15 }
 0x8a8   : > { %2442 = vmatprep.subr.bf16.mxu0 %v2606_v31 }
 0x8aa   : > { %2431 = vmatpush3.bf16.msra.mxu1 %v2513_v60 }
 0x8ab   : > { %2443 = vmatpush3.bf16.msra.mxu0 %v2517_v16  ;;  %v2546_v16 = vld [vmem:[%s3114_s22] sm:$0xff] (!%p2290_p6)  }
 0x970   : > { %v1616_v42 = vpop.f32.mrb[20].mxu0 }
 0x971   : > { %v2426_v43 = vpop.f32.mrb[21].mxu0 }
 0x972   : > { %v1619_v44 = vpop.f32.mrb[22].mxu0 }
 0x973   : > { %v2427_v45 = vpop.f32.mrb[23].mxu0  ;;  %v2282_v44 = vld [vmem:[%s839_s26] ss:$0 sm:$0xff] }
 0x978   : > { %v1573_v46 = vpop.f32.mrb[24].mxu1 }
 0x979   : > { %v1617_v47 = vadd.f32 %v1616_v42, %v1573_v46  ;;  %v2420_v48 = vpop.f32.mrb[25].mxu1 }
 0x97a   : > { %v1576_v49 = vpop.f32.mrb[26].mxu1 }
 0x97b   : > { %v1630_v50 = vadd.f32 %v2920_v63, %v1617_v47  ;;  %v2421_v51 = vpop.f32.mrb[27].mxu1 }
 0x97d   : > { %v1632_v52 = vadd.f32 %v1630_v50, %v2827_v34  ;;  %v1654_v34 = vmul.f32 0.03125, %v1650_v61 }
 0x97f   : > { %v1638_v53 = vsel %vm927_vm2, %v1632_v52, 0.0  ;;  %v1656_v62 = vadd.f32 1e-12, %v1654_v34 }
 0x980   : > { %1639 = vadd.xlane.f32.xlu0 %v1638_v53 }
 0x981   : > { %2534 = vrsqrt.f32 %v1656_v62 }
 0x98b   : > { %v2535_v2 = vpop.eup %2534 }
 0x98c   : > { %v1660_v3 = vmul.f32 %v2535_v2, %v2931_v17  ;;  %v2278_v17 = vld [vmem:[%s831_s6] ss:$0 sm:$0xff]  ;;  %s3117_s6 = sld [smem:[#allocation16_spill]] (!%p2290_p6) }
 0x98e   : > { %v1668_v6 = vmul.f32 %v2276_v4, %v1660_v3 }
 0x990   : > { %v1676_v11 = vadd.f32 %v2277_v9, %v1668_v6 }
 0xa0d   : > { %v1640_v54 = vpop.xlane.xlu0 %1639 }
 0xa0e   : > { %v1643_v55 = vmul.f32 0.03125, %v1640_v54 }
 0xa10   : > { %v1645_v56 = vsub.f32 %v1632_v52, %v1643_v55 }
 0xa12   : > { %v1647_v57 = vmul.f32 %v1645_v56, %v1645_v56 }
 0xa14   : > { %v1651_v58 = vsel %vm927_vm2, %v1647_v57, 0.0 }
 0xa15   : > { %1652 = vadd.xlane.f32.xlu0 %v1651_v58 }
 0xaa2   : > { %v1653_v63 = vpop.xlane.xlu0 %1652 }
 0xaa3   : > { %v1655_v0 = vmul.f32 0.03125, %v1653_v63 }
 0xaa5   : > { %v1657_v1 = vadd.f32 1e-12, %v1655_v0 }
 0xaa7   : > { %2536 = vrsqrt.f32 %v1657_v1 }
 0xab1   : > { %v2537_v5 = vpop.eup %2536 }
 0xab2   : > { %v1661_v7 = vmul.f32 %v2537_v5, %v1645_v56 }
 0xab4   : > { %v1669_v10 = vmul.f32 %v2276_v4, %v1661_v7  ;;  %v2288_v7 = vld [vmem:[%s842_s4] ss:$0 sm:$0xff] }
 0xab6   : > { %v1677_v12 = vadd.f32 %v2277_v9, %v1669_v10 }
 0xab8   : > { %v1678_v33 = vpack.c.bf16 %v1677_v12, %v1676_v11 }
 0xaba   : > { %2433 = vmatmul.mubr.msk.bf16.vlgmr.msra.gmra.mrb[28].mxu1 %vm927_vm2, %v1678_v33 }
 0xb8d   : > { %v1739_v18 = vpop.f32.mrb[28].mxu1 }
 0xb8e   : > { %v1740_v19 = vadd.f32 %v2278_v17, %v1739_v18  ;;  %v2434_v20 = vpop.f32.mrb[29].mxu1  ;;  %v2547_v18 = vld [vmem:[%s3115_s28 + $0x8] sm:$0xff] (!%p2290_p6)  }
 0xb8f   : > { %v1742_v22 = vpop.f32.mrb[30].mxu1 }
 0xb90   : > { %v1748_v23 = vmul.f32 0.044715, %v1740_v19  ;;  %v1743_v24 = vadd.f32 %v2278_v17, %v1742_v22  ;;  %v2435_v25 = vpop.f32.mrb[31].mxu1  ;;  %v1746_v39 = vmul.f32 0.5, %v1740_v19  ;;  %v2613_v17 = vmov (!%p2290_p6), 0.0  }
 0xb91   : > { %2448 = vmatprep.subr.bf16.mxu0 (!%p2290_p6), %v2613_v17  ;;  %2456 = vmatprep.subr.bf16.mxu1 (!%p2290_p6), %v2613_v17  ;;  %v2291_v25 = vld [vmem:[%s3117_s6] ss:$0 sm:$0xff] (!%p2290_p6) }
 0xb92   : > { %v1750_v26 = vmul.f32 %v1748_v23, %v1740_v19  ;;  %v1749_v8 = vmul.f32 0.044715, %v1743_v24  ;;  %v1747_v40 = vmul.f32 0.5, %v1743_v24  ;;  %2460 = vmatprep.mubr.msk.bf16.mxu1 (!%p2290_p6), %vm2614_vm7, %v2613_v17  ;;  %v2548_v23 = vld [vmem:[%s3116_s17] sm:$0xff] (!%p2290_p6)  }
 0xb93   : > { %2457 = vmatpush3.bf16.msra.mxu1 (!%p2290_p6), %v2548_v23 }
 0xb94   : > { %v1752_v27 = vmul.f32 %v1750_v26, %v1740_v19  ;;  %v1751_v28 = vmul.f32 %v1749_v8, %v1743_v24  ;;  %2458 = vmatprep.subr.bf16.mxu1 (!%p2290_p6), %v2613_v17 }
 0xb96   : > { %v1754_v29 = vadd.f32 %v1752_v27, %v1740_v19  ;;  %v1753_v30 = vmul.f32 %v1751_v28, %v1743_v24 }
 0xb98   : > { %v1756_v31 = vmul.f32 0.7978846, %v1754_v29  ;;  %v1755_v32 = vadd.f32 %v1753_v30, %v1743_v24  ;;  %v2549_v24 = vld [vmem:[%s3116_s17 + $0x8] sm:$0xff] (!%p2290_p6)  }
 0xb99   : > { %2459 = vmatpush3.bf16.msra.mxu1 (!%p2290_p6), %v2549_v24 }
 0xb9a   : > { %2538 = vtanh.f32 %v1756_v31  ;;  %v1757_v35 = vmul.f32 0.7978846, %v1755_v32  ;;  %v2295_v32 = vld [vmem:[%s3118_s0] ss:$0 sm:$0xff] (!%p2290_p6) }
 0xb9c   : > { %2540 = vtanh.f32 %v1757_v35 }
 0xba4   : > { %v2539_v36 = vpop.eup %2538 }
 0xba5   : > { %v1760_v37 = vadd.f32 1.0, %v2539_v36 }
 0xba6   : > { %v2541_v38 = vpop.eup %2540 }
 0xba7   : > { %v1761_v41 = vadd.f32 1.0, %v2541_v38  ;;  %v1762_v21 = vmul.f32 %v1760_v37, %v1746_v39 }
 0xba9   : > { %v1763_v42 = vmul.f32 %v1761_v41, %v1747_v40 }
 0xbab   : > { %v1764_v43 = vpack.c.bf16 %v1763_v42, %v1762_v21 }
 0xbad   : > { %2445 = vmatmul.mubr.msk.bf16.vlgmr.msra.gmra.mrb[24].mxu0 %vm1804_vm6, %v1764_v43 }
 0xbae   : > { %2449 = vmatpush3.bf16.msra.mxu0 (!%p2290_p6), %v2546_v16  ;;  %2452 = vmatprep.mubr.msk.bf16.mxu0 (!%p2290_p6), %vm2614_vm7, %v2613_v17 }
 0xbaf   : > { %2450 = vmatprep.subr.bf16.mxu0 (!%p2290_p6), %v2613_v17 }
 0xbb2   : > { %2451 = vmatpush3.bf16.msra.mxu0 (!%p2290_p6), %v2547_v18 }
 0xc80   : > { %v1842_v45 = vpop.f32.mrb[24].mxu0 }
 0xc81   : > { %v1843_v46 = vadd.f32 %v2282_v44, %v1842_v45  ;;  %v2446_v47 = vpop.f32.mrb[25].mxu0 }
 0xc82   : > { %v1845_v48 = vpop.f32.mrb[26].mxu0 }
 0xc83   : > { %v1846_v49 = vadd.f32 %v2282_v44, %v1845_v48  ;;  %v2447_v50 = vpop.f32.mrb[27].mxu0  ;;  %v1849_v51 = vadd.f32 %v1843_v46, %v1676_v11  ;;  %v2289_v11 = vld [vmem:[%s845_s18] ss:$0 sm:$0xff] }
 0xc85   : > { %v1853_v52 = vsel %vm927_vm2, %v1849_v51, 0.0  ;;  %v1850_v53 = vadd.f32 %v1846_v49, %v1677_v12 }
 0xc86   : > { %1854 = vadd.xlane.f32.xlu1 %v1853_v52 }
 0xc87   : > { %v1856_v54 = vsel %vm927_vm2, %v1850_v53, 0.0 }
 0xc88   : > { %1857 = vadd.xlane.f32.xlu0 %v1856_v54 }
 0xd13   : > { %v1855_v55 = vpop.xlane.xlu1 %1854 }
 0xd14   : > { %v1859_v56 = vmul.f32 0.03125, %v1855_v55 }
 0xd15   : > { %v1858_v57 = vpop.xlane.xlu0 %1857 }
 0xd16   : > { %v1861_v58 = vsub.f32 %v1849_v51, %v1859_v56  ;;  %v1860_v59 = vmul.f32 0.03125, %v1858_v57 }
 0xd18   : > { %v1862_v60 = vsub.f32 %v1850_v53, %v1860_v59  ;;  %v1863_v61 = vmul.f32 %v1861_v58, %v1861_v58 }
 0xd1a   : > { %v1865_v34 = vsel %vm927_vm2, %v1863_v61, 0.0  ;;  %v1864_v62 = vmul.f32 %v1862_v60, %v1862_v60 }
 0xd1b   : > { %1866 = vadd.xlane.f32.xlu1 %v1865_v34 }
 0xd1c   : > { %v1868_v63 = vsel %vm927_vm2, %v1864_v62, 0.0 }
 0xd1d   : > { %1869 = vadd.xlane.f32.xlu0 %v1868_v63 }
 0xda8   : > { %v1867_v0 = vpop.xlane.xlu1 %1866 }
 0xda9   : > { %v1871_v1 = vmul.f32 0.03125, %v1867_v0 }
 0xdaa   : > { %v1870_v2 = vpop.xlane.xlu0 %1869 }
 0xdab   : > { %v1873_v3 = vadd.f32 1e-12, %v1871_v1  ;;  %v1872_v4 = vmul.f32 0.03125, %v1870_v2 }
 0xdad   : > { %2542 = vrsqrt.f32 %v1873_v3  ;;  %v1874_v5 = vadd.f32 1e-12, %v1872_v4 }
 0xdaf   : > { %2544 = vrsqrt.f32 %v1874_v5 }
 0xdb7   : > { %v2543_v6 = vpop.eup %2542 }
 0xdb8   : > { %v1877_v9 = vmul.f32 %v2543_v6, %v1861_v58 }
 0xdb9   : > { %v2545_v10 = vpop.eup %2544 }
 0xdba   : > { %v1885_v12 = vmul.f32 %v2288_v7, %v1877_v9  ;;  %v1878_v33 = vmul.f32 %v2545_v10, %v1862_v60  ;;  %1900 = sbr.rel (%p2290_p6) target bundleno = 3967 (0xf7f), region = 108 }
 0xdbc   : > { %v1893_v13 = vadd.f32 %v2289_v11, %v1885_v12  ;;  %v1886_v14 = vmul.f32 %v2288_v7, %v1878_v33 }
 0xdbe   : > { %1895 = vst.msk [vmem:[#allocation2] sm:$0xff] %vm927_vm2, %v1893_v13  ;;  %v1894_v15 = vadd.f32 %v2289_v11, %v1886_v14 }
 0xdc0   : > { %1896 = vst.msk [vmem:[#allocation2 + $0x8] sm:$0xff] %vm927_vm2, %v1894_v15  ;;  %v1902_v19 = vrot.slane (!%p2290_p6), %v1894_v15, 7 }
 0xdc2   : > { %v1905_v20 = vsel %vm1904_vm8, %v1893_v13, %v1902_v19 }
 0xdc3   : > { %v1906_v22 = vpack.c.bf16 %v1905_v20, %v1905_v20 }
 0xdc5   : > { %2453 = vmatmul.mubr.msk.bf16.vlgmr.msra.gmra.mrb[0].mxu0 %vm927_vm2, %v1906_v22 }
 0xe98   : > { %v1967_v26 = vpop.f32.mrb[0].mxu0 }
 0xe99   : > { %v1968_v8 = vadd.f32 %v2291_v25, %v1967_v26  ;;  %v2454_v27 = vpop.f32.mrb[1].mxu0 }
 0xe9a   : > { %v1970_v28 = vpop.f32.mrb[2].mxu0 }
 0xe9b   : > { %2550 = vtanh.f32 %v1968_v8  ;;  %v2455_v29 = vpop.f32.mrb[3].mxu0 }
 0xea5   : > { %v2551_v30 = vpop.eup %2550 }
 0xea6   : > { %v1974_v31 = vpack.c.bf16 %v2551_v30, %v2551_v30 }
 0xea8   : > { %2461 = vmatmul.mubr.msk.bf16.vlgmr.msra.gmra.mrb[0].mxu1 %vm927_vm2, %v1974_v31 }
 0xf7b   : > { %v2035_v35 = vpop.f32.mrb[0].mxu1 }
 0xf7c   : > { %v2036_v36 = vadd.f32 %v2295_v32, %v2035_v35  ;;  %v2462_v37 = vpop.f32.mrb[1].mxu1 }
 0xf7d   : > { %v2038_v38 = vpop.f32.mrb[2].mxu1 }
 0xf7e   : > { %2042 = vst.msk [vmem:[#allocation3] sm:$0x3] %vm2041_vm9, %v2036_v36  ;;  %v2463_v39 = vpop.f32.mrb[3].mxu1 }
 0xf7f PF: > { %s3119_s24 = sld [smem:[#allocation7_spill]]  ;;  %s2615_s16 = smov [#allocation3]  }
 0xf80   : > { %s2052_s22 = sshll.u32 %s2615_s16, 4  ;;  %s2053_s22 = int_to_ptr.vmem [resolvable:$true] %s2052_s22 }
 0xf81   : > { %s2552_s18 = scalar_lea.vmem %s2053_s22, 32  ;;  %p2559_p11 = scmp.lt.s32.totalorder %s2053_s22, %s2053_s22 }
 0xf82   : > { %p2553_p8 = scmp.ne.s32.totalorder %s2053_s22, %s2552_s18  ;;  %p2560_p12 = scmp.lt.s32.totalorder %s2552_s18, %s2552_s18 }
 0xf84   : > { %p2561_p13 = por %p2560_p12, %p2559_p11 }
 0xf85   : > { %s3120_s21 = sadd.s32 4294967295, %s3119_s24  }
 0xf86   : > { %p3027_p7 = scmp.eq.s32.totalorder %s3120_s21, 1 }
 0xf88   : > { %p2554_p9 = pnand %p2553_p8, %p3027_p7 }
 0xf8a   : > { %p2555_p10 = pneg %p2554_p9 }
 0xf8c   : > { %p2562_p0 = pnand %p2561_p13, %p2555_p10 }
 0xf8e   : > { %2565 = shalt.err (!%p2562_p0)
}
 0xf8f   : > { %s3122_s30 = sld [smem:[#allocation19_spill]] }
 0xf95   : > { %s2566_s19 = scalar_lea.hbm %s3122_s30, 32 }
 0xf96   : > { %p2567_p1 = scmp.ne.s32.totalorder %s3122_s30, %s2566_s19  ;;  %p2572_p4 = scmp.lt.u32.totalorder %s2566_s19, %s3122_s30 }
 0xf98   : > { %p2568_p2 = pnand %p2567_p1, %p3027_p7 }
 0xf9a   : > { %p2569_p3 = pneg %p2568_p2 }
 0xf9c   : > { %p2574_p5 = pnand %p2572_p4, %p2569_p3 }
 0xf9e   : > { %2577 = shalt.err (!%p2574_p5)
}
 0xf9f   : > { %2465 = dma.vmem_to_hbm [thread:$0]  (%p3027_p7), %s2053_s22, 32, %s3122_s30, [#allocation4]  }
 0xfa0   : > { %2591 = dma.done.wait (%p3027_p7), [#allocation4], 32  }
 0xfa1   : > { %2593 = vsyncadd (%p3027_p7), [#allocation4], 4294967264 }
 0xfa2 PF: > { %s3123_s0 = sld [smem:[#allocation7_spill]]  ;;  %s3124_s1 = sld [smem:[#allocation6_spill]] }
 0xfa3   : > { %s3125_s22 = sld [smem:[#allocation8_spill]] }
 0xfa8   : > { %s31_s23 = sadd.s32 1, %s3123_s0  }
 0xfa9   : > { %p28_p6 = scmp.ge.s32.totalorder %s31_s23, 4  }
 0xfab   :  { %30 = sbr.rel (!%p28_p6) target bundleno = 14 (0xe), region = 176 }
 0xfb2   :  { %2065 = vsyncpa [#allocation4], 1 }
 0xfb3   :  { %2067 = vsyncpa [#allocation4 + $0x1], 1 }

</bundles_post_ra>
